<compile_context>
chip_gen: v7x
topology: tpu7x:2x2x1
jax: 0.10.0
libtpu: 0.0.40
codegen_flags: <defaults>
</compile_context>

<pallas_src>
import numpy as np
import jax
import jax.numpy as jnp
from jax.experimental import pallas as pl
from jax.experimental.pallas import tpu as pltpu


# Architecture constants of Generator_cnn (independent of `dim`):
#   latent -> (8d, 2, 4) -> l1(k=2,s=2) -> (4d, 4, 8) -> l2(k=(3,2),s=(1,2))
#   -> (2d, 6, 16) -> l3(k=(3,2),s=(1,2)) -> (d, 8, 32)
#   -> l4(k=(3,11),s=(1,1)) -> (1, 10, 42) -> view/permute -> (B, 5, 1, 84)
_H = (2, 4, 6, 8, 10)      # heights through the conv stack
_W = (4, 8, 16, 32, 42)    # widths through the conv stack
_LANE_PAD4 = 128           # layer-4 tap width (42) padded to one lane tile


# ----------------------------------------------------------------------------
# The fused kernel: one batch tile per grid step.
# ----------------------------------------------------------------------------
def _generator_kernel(z_ref, wfc_ref, bfc_ref, m1_ref, b1_ref, m2_ref, b2_ref,
                      m3_ref, b3_ref, m4_ref, b4_ref, out_ref,
                      s0_ref, s1_ref, s2_ref, s3_ref, s4_ref):
    f32 = jnp.float32
    bf16 = jnp.bfloat16
    bt = z_ref.shape[0]                       # batch-tile rows (multiple of 8)
    cw = m1_ref.shape[0]                      # 32 * dim (=256 at dim=8)
    n4 = m4_ref.shape[1] // 3                 # padded layer-4 tap width (128)

    def leaky(v):                             # LeakyReLU(0.01) in f32
        return jnp.where(v >= 0.0, v, 0.01 * v)

    # -- latent_to_features: Linear + ReLU.  FC columns are pre-permuted to
    #    (ih, cin, iw) order, so the two cw-wide halves are the two input rows
    #    of layer1; stack them (ih, b)-major into scratch s0.
    h = jnp.dot(z_ref[...].astype(bf16), wfc_ref[...],
                preferred_element_type=f32)                         # (bt, 2cw)
    h = jnp.maximum(h + bfc_ref[...], 0.0)
    s0_ref[pl.ds(0, bt), :] = h[:, 0:cw]
    s0_ref[pl.ds(bt, bt), :] = h[:, cw:2 * cw]
    a0 = s0_ref[...].astype(bf16)             # (2bt, cw) — cast ONCE

    # -- layer1: ConvT(8d->4d, k=2, s=2).  stride == kernel -> no height
    #    overlap.  Wide RHS holds both kh taps; output row group = 2*ih + kh.
    p1 = jnp.dot(a0, m1_ref[...], preferred_element_type=f32)       # (2bt, 2cw)
    for ih in range(2):
        for kh in range(2):
            s1_ref[pl.ds((2 * ih + kh) * bt, bt), :] = \
                p1[ih * bt:(ih + 1) * bt, kh * cw:(kh + 1) * cw]
    a1 = leaky(s1_ref[...] + b1_ref[...]).astype(bf16)              # (4bt, cw)

    # -- stride-1-height deconv (3 taps): ONE wide matmul, then overlap-add of
    #    lane-aligned column groups into a VMEM scratch (rows are (h, b)-major
    #    so tap kh lands at row offset kh*bt).
    def deconv_h3(a, m_ref, b_ref, s_ref, h_in):
        n = m_ref.shape[1] // 3
        p = jnp.dot(a, m_ref[...], preferred_element_type=f32)      # (h_in*bt, 3n)
        s_ref[...] = jnp.zeros_like(s_ref)
        for kh in range(3):
            s_ref[pl.ds(kh * bt, h_in * bt), :] += p[:, kh * n:(kh + 1) * n]
        return s_ref[...] + b_ref[...]

    a2 = leaky(deconv_h3(a1, m2_ref, b2_ref, s2_ref, 4)).astype(bf16)   # (6bt, cw)
    a3 = leaky(deconv_h3(a2, m3_ref, b3_ref, s3_ref, 6)).astype(bf16)   # (8bt, cw)

    # -- layer4: ConvT(d->1, k=(3,11), s=1) + Sigmoid.  Taps are padded to 128
    #    lanes host-side (columns 42..127 stay zero and are dropped below).
    y = jax.nn.sigmoid(deconv_h3(a3, m4_ref, b4_ref, s4_ref, 8))        # (10bt, n4)

    # -- single contiguous (oh, b, w) store; batch-major rearrange in wrapper.
    out_ref[...] = y.reshape(10, bt, n4)[:, :, 0:out_ref.shape[2]]


# ----------------------------------------------------------------------------
# One-time host-side weight packing.
# ----------------------------------------------------------------------------
def _deconv_tap_matrix(w, kh, w_in, s_w):
    """One height-tap of a PyTorch ConvTranspose2d weight as a dense matrix.

    w: (Cin, Cout, KH, KW).  Returns f32 (Cin*w_in, Cout*w_out) with
      M[cin*w_in + iw, cout*w_out + s_w*iw + kw] = w[cin, cout, kh, kw]
    i.e. channel contraction + width scatter (incl. width stride) baked in.
    """
    w = np.asarray(w, np.float32)
    cin, cout, _, kw_n = w.shape
    w_out = (w_in - 1) * s_w + kw_n
    m = np.zeros((cin * w_in, cout * w_out), np.float32)
    for kw in range(kw_n):
        for iw in range(w_in):
            m[iw::w_in, (s_w * iw + kw)::w_out] = w[:, :, kh, kw]
    return m


def _deconv_wide_matrix(w, w_in, s_w, pad_n=None):
    """All kh taps packed side-by-side along columns (one wide MXU matmul).

    Tap kh occupies columns [kh*n_pad, kh*n_pad + Cout*w_out); n_pad lets the
    42-wide layer-4 taps start on 128-lane boundaries.
    """
    w = np.asarray(w, np.float32)
    cin, cout, kh_n, kw_n = w.shape
    w_out = (w_in - 1) * s_w + kw_n
    n = cout * w_out
    n_pad = n if pad_n is None else pad_n
    assert n_pad >= n
    wide = np.zeros((cin * w_in, kh_n * n_pad), np.float32)
    for kh in range(kh_n):
        wide[:, kh * n_pad:kh * n_pad + n] = _deconv_tap_matrix(w, kh, w_in, s_w)
    return wide


def _bias_row(b, w_out, pad_to=None):
    row = np.repeat(np.asarray(b, np.float32), w_out)
    if pad_to is not None and pad_to > row.size:
        row = np.concatenate([row, np.zeros(pad_to - row.size, np.float32)])
    return row[None, :]


def init_params(key, latent_dim, dim):
    ks = jax.random.split(key, 10)
    s = 0.1
    return {
        "w_fc": s * jax.random.normal(ks[0], (latent_dim, 8 * dim * 2 * 4), jnp.float32),
        "b_fc": s * jax.random.normal(ks[1], (8 * dim * 2 * 4,), jnp.float32),
        # ConvTranspose2d weights, PyTorch layout (Cin, Cout, kH, kW)
        "w1": s * jax.random.normal(ks[2], (8 * dim, 4 * dim, 2, 2), jnp.float32),
        "b1": s * jax.random.normal(ks[3], (4 * dim,), jnp.float32),
        "w2": s * jax.random.normal(ks[4], (4 * dim, 2 * dim, 3, 2), jnp.float32),
        "b2": s * jax.random.normal(ks[5], (2 * dim,), jnp.float32),
        "w3": s * jax.random.normal(ks[6], (2 * dim, dim, 3, 2), jnp.float32),
        "b3": s * jax.random.normal(ks[7], (dim,), jnp.float32),
        "w4": s * jax.random.normal(ks[8], (dim, 1, 3, 11), jnp.float32),
        "b4": s * jax.random.normal(ks[9], (1,), jnp.float32),
    }


def prepare_params(raw, latent_dim, dim):
    """One-time packing: FC column permutation (output already in the kernel's
    (ih, cin, iw) order), per-layer WIDE deconv matrices (all height taps
    packed along columns, layer-4 taps lane-padded to 128), width-broadcast
    bias rows.  Matmul operands bf16, biases f32."""
    d = dim
    wfc = np.asarray(raw["w_fc"], np.float32).reshape(latent_dim, 8 * d, 2, 4)
    wfc = wfc.transpose(0, 2, 1, 3).reshape(latent_dim, 8 * d * 2 * 4)
    bfc = np.asarray(raw["b_fc"], np.float32).reshape(8 * d, 2, 4)
    bfc = bfc.transpose(1, 0, 2).reshape(1, -1)

    # CW = 32*dim; with dim a multiple of 4/8, CW is a multiple of 128/256 so
    # every column-group slice in the kernel is lane-aligned.  For odd dims,
    # pad the packed matrices host-side rather than letting Mosaic pad.
    m1 = _deconv_wide_matrix(raw["w1"], w_in=_W[0], s_w=2)                    # (CW, 2*CW)
    m2 = _deconv_wide_matrix(raw["w2"], w_in=_W[1], s_w=2)                    # (CW, 3*CW)
    m3 = _deconv_wide_matrix(raw["w3"], w_in=_W[2], s_w=2)                    # (CW, 3*CW)
    m4 = _deconv_wide_matrix(raw["w4"], w_in=_W[3], s_w=1, pad_n=_LANE_PAD4)  # (CW, 3*128)

    bf = lambda a: jnp.asarray(a, jnp.bfloat16)
    f32 = lambda a: jnp.asarray(a, jnp.float32)
    return {
        "wfc": bf(wfc), "bfc": f32(bfc),
        "m1": bf(m1), "b1": f32(_bias_row(raw["b1"], _W[1])),
        "m2": bf(m2), "b2": f32(_bias_row(raw["b2"], _W[2])),
        "m3": bf(m3), "b3": f32(_bias_row(raw["b3"], _W[3])),
        "m4": bf(m4), "b4": f32(_bias_row(raw["b4"], _W[4], pad_to=_LANE_PAD4)),
    }


# ----------------------------------------------------------------------------
# Batch tiling + VMEM budget heuristics.
# ----------------------------------------------------------------------------
def _choose_batch_tiling(B):
    """block_b multiple of 8 (bf16 sublane packing).  Small batches: ONE grid
    step (no serial loop of tiny-M matmuls).  Large batches: ~128-row blocks,
    grid marked "parallel" so v7x's two TensorCores both get work."""
    b8 = ((B + 7) // 8) * 8
    if b8 <= 128:
        return b8, 1
    n_blocks = (b8 + 127) // 128
    block_b = (-(-b8 // n_blocks) + 7) // 8 * 8
    return block_b, n_blocks


def _vmem_limit_bytes(block_b, latent, cw, n4, weights):
    """Rough VMEM budget: double-buffered weights + scratch + f32 temporaries
    (with 2x margin), clamped to [16 MiB, 64 MiB] so it is valid on all of
    v5e / v6e / v7x."""
    w_bytes = sum(int(np.prod(w.shape)) * w.dtype.itemsize for w in weights)
    f32 = 4
    scratch = ((2 + 4 + 6 + 8) * cw + 10 * n4) * block_b * f32
    temps = (2 * cw + 2 * 2 * cw + 4 * 3 * cw + 6 * 3 * cw
             + 8 * 3 * n4 + 10 * n4) * block_b * f32
    io = (latent + 10 * _W[4]) * block_b * f32 * 2
    est = 2 * w_bytes + scratch + 2 * temps + io + (4 << 20)
    return int(min(max(est, 16 << 20), 64 << 20))


# ----------------------------------------------------------------------------
# Forward: one pallas_call, grid over batch tiles.
# ----------------------------------------------------------------------------
def generator_cnn_forward(z, kp, *, block_b=None):
    B, latent = z.shape
    if block_b is None:
        block_b, n_blocks = _choose_batch_tiling(B)
    else:
        block_b = ((block_b + 7) // 8) * 8
        n_blocks = pl.cdiv(B, block_b)
    Bp = block_b * n_blocks

    z = z.astype(jnp.float32)
    if Bp != B:
        z = jnp.concatenate([z, jnp.zeros((Bp - B, latent), jnp.float32)], axis=0)

    cw = kp["m1"].shape[0]                    # 32 * dim
    n4 = kp["m4"].shape[1] // 3               # padded layer-4 tap width
    weights = (kp["wfc"], kp["bfc"], kp["m1"], kp["b1"], kp["m2"], kp["b2"],
               kp["m3"], kp["b3"], kp["m4"], kp["b4"])

    # All packed weights / bias rows are 2-D and stay resident in VMEM
    # (constant index_map -> no re-DMA across grid steps).
    w_specs = [pl.BlockSpec(w.shape, lambda i: (0, 0)) for w in weights]

    out = pl.pallas_call(
        _generator_kernel,
        out_shape=jax.ShapeDtypeStruct((10, Bp, _W[4]), jnp.float32),
        grid=(n_blocks,),
        in_specs=[pl.BlockSpec((block_b, latent), lambda i: (i, 0))] + w_specs,
        out_specs=pl.BlockSpec((10, block_b, _W[4]), lambda i: (0, i, 0)),
        scratch_shapes=[
            pltpu.VMEM((2 * block_b, cw), jnp.float32),    # layer1 input rows
            pltpu.VMEM((4 * block_b, cw), jnp.float32),    # layer1 output
            pltpu.VMEM((6 * block_b, cw), jnp.float32),    # layer2 overlap-add
            pltpu.VMEM((8 * block_b, cw), jnp.float32),    # layer3 overlap-add
            pltpu.VMEM((10 * block_b, n4), jnp.float32),   # layer4 overlap-add
        ],
        compiler_params=pltpu.CompilerParams(
            dimension_semantics=("parallel",),
            vmem_limit_bytes=_vmem_limit_bytes(block_b, latent, cw, n4, weights)),
    )(z, *weights)

    # (10, Bp, 42) -> (B, 10, 42); PyTorch view(-1,1,5,84).permute(0,2,1,3)
    # is exactly a reshape of the flat (10,42) block to (5,1,84).
    out = out.transpose(1, 0, 2)[:B]
    return out.reshape(B, 5, 1, 84)


# ----------------------------------------------------------------------------
# Pure-NumPy reference (exact PyTorch ConvTranspose2d semantics) for checking.
# ----------------------------------------------------------------------------
def _reference_forward_np(z, raw, dim):
    def deconv(x, w, b, s):
        w = np.asarray(w, np.float32)
        b = np.asarray(b, np.float32)
        bsz, cin, h, wd = x.shape
        _, cout, kh_n, kw_n = w.shape
        oh = (h - 1) * s[0] + kh_n
        ow = (wd - 1) * s[1] + kw_n
        y = np.zeros((bsz, cout, oh, ow), np.float32)
        for kh in range(kh_n):
            for kw in range(kw_n):
                y[:, :, kh:kh + (h - 1) * s[0] + 1:s[0],
                      kw:kw + (wd - 1) * s[1] + 1:s[1]] += np.einsum(
                          "bchw,cd->bdhw", x, w[:, :, kh, kw])
        return y + b.reshape(1, cout, 1, 1)

    leaky = lambda v: np.where(v >= 0.0, v, 0.01 * v)
    z = np.asarray(z, np.float32)
    h = np.maximum(z @ np.asarray(raw["w_fc"], np.float32)
                   + np.asarray(raw["b_fc"], np.float32), 0.0)
    x = h.reshape(-1, 8 * dim, 2, 4)
    x = leaky(deconv(x, raw["w1"], raw["b1"], (2, 2)))
    x = leaky(deconv(x, raw["w2"], raw["b2"], (1, 2)))
    x = leaky(deconv(x, raw["w3"], raw["b3"], (1, 2)))
    x = 1.0 / (1.0 + np.exp(-deconv(x, raw["w4"], raw["b4"], (1, 1))))
    return x.reshape(-1, 1, 5, 84).transpose(0, 2, 1, 3)


if __name__ == "__main__":
    batch, latent_dim, dim = 2, 32, 8
    img_size = (1, 5, 84)  # unused in forward (matches reference module)

    key = jax.random.PRNGKey(0)
    k_param, k_z = jax.random.split(key)
    raw = init_params(k_param, latent_dim, dim)
    kparams = prepare_params(raw, latent_dim, dim)      # one-time host packing
    z = jax.random.normal(k_z, (batch, latent_dim), jnp.float32)

    fwd = jax.jit(generator_cnn_forward)
    out = jax.block_until_ready(fwd(z, kparams))

    assert out.shape == (batch, 5, 1, 84), out.shape
    assert out.dtype == jnp.float32
    assert bool(jnp.all(jnp.isfinite(out)))
    assert bool(jnp.all((out >= 0.0) & (out <= 1.0)))

    # numerical check against exact f32 PyTorch-semantics reference
    ref = _reference_forward_np(np.asarray(z), raw, dim)
    err = float(np.max(np.abs(np.asarray(out) - ref)))
    assert err < 5e-2, f"max abs err vs reference = {err}"

    print("KERNEL_OK")
</pallas_src>

<mosaic_0001>
module attributes {stable_mosaic.version = 11 : i64} {
  func.func @_generator_kernel(%arg0: i32, %arg1: memref<8x32xf32, #tpu.memory_space<vmem>>, %arg2: memref<32x512xbf16, #tpu.memory_space<vmem>>, %arg3: memref<1x512xf32, #tpu.memory_space<vmem>>, %arg4: memref<256x512xbf16, #tpu.memory_space<vmem>>, %arg5: memref<1x256xf32, #tpu.memory_space<vmem>>, %arg6: memref<256x768xbf16, #tpu.memory_space<vmem>>, %arg7: memref<1x256xf32, #tpu.memory_space<vmem>>, %arg8: memref<256x768xbf16, #tpu.memory_space<vmem>>, %arg9: memref<1x256xf32, #tpu.memory_space<vmem>>, %arg10: memref<256x384xbf16, #tpu.memory_space<vmem>>, %arg11: memref<1x128xf32, #tpu.memory_space<vmem>>, %arg12: memref<10x8x42xf32, #tpu.memory_space<vmem>>, %arg13: memref<16x256xf32, #tpu.memory_space<vmem>>, %arg14: memref<32x256xf32, #tpu.memory_space<vmem>>, %arg15: memref<48x256xf32, #tpu.memory_space<vmem>>, %arg16: memref<64x256xf32, #tpu.memory_space<vmem>>, %arg17: memref<80x128xf32, #tpu.memory_space<vmem>>) attributes {dimension_semantics = [#tpu.dimension_semantics<parallel>], iteration_bounds = array<i64: 1>, scalar_prefetch = 0 : i64, scratch_operands = 5 : i64, tpu.core_type = #tpu.core_type<tc>, window_params = [{transform_indices = @transform_0, window_bounds = array<i64: 8, 32>}, {pipeline_mode = #tpu.pipeline_mode<synchronous>, transform_indices = @transform_1, window_bounds = array<i64: 32, 512>}, {pipeline_mode = #tpu.pipeline_mode<synchronous>, transform_indices = @transform_2, window_bounds = array<i64: 1, 512>}, {pipeline_mode = #tpu.pipeline_mode<synchronous>, transform_indices = @transform_3, window_bounds = array<i64: 256, 512>}, {pipeline_mode = #tpu.pipeline_mode<synchronous>, transform_indices = @transform_4, window_bounds = array<i64: 1, 256>}, {pipeline_mode = #tpu.pipeline_mode<synchronous>, transform_indices = @transform_5, window_bounds = array<i64: 256, 768>}, {pipeline_mode = #tpu.pipeline_mode<synchronous>, transform_indices = @transform_6, window_bounds = array<i64: 1, 256>}, {pipeline_mode = #tpu.pipeline_mode<synchronous>, transform_indices = @transform_7, window_bounds = array<i64: 256, 768>}, {pipeline_mode = #tpu.pipeline_mode<synchronous>, transform_indices = @transform_8, window_bounds = array<i64: 1, 256>}, {pipeline_mode = #tpu.pipeline_mode<synchronous>, transform_indices = @transform_9, window_bounds = array<i64: 256, 384>}, {pipeline_mode = #tpu.pipeline_mode<synchronous>, transform_indices = @transform_10, window_bounds = array<i64: 1, 128>}, {transform_indices = @transform_11, window_bounds = array<i64: 10, 8, 42>}]} {
    %c0 = arith.constant 0 : index
    %c0_0 = arith.constant 0 : index
    %0 = vector.load %arg1[%c0, %c0_0] : memref<8x32xf32, #tpu.memory_space<vmem>>, vector<8x32xf32>
    %1 = arith.truncf %0 : vector<8x32xf32> to vector<8x32xbf16>
    %c0_1 = arith.constant 0 : index
    %c0_2 = arith.constant 0 : index
    %2 = vector.load %arg2[%c0_1, %c0_2] : memref<32x512xbf16, #tpu.memory_space<vmem>>, vector<32x512xbf16>
    %cst = arith.constant dense<0.000000e+00> : vector<8x512xf32>
    %3 = tpu.matmul %1, %2, %cst {dimension_numbers = #tpu.dot_dimension_numbers<[1], [0], [0], [1], [0, 0, 1, 1], [], []>} : vector<8x32xbf16>, vector<32x512xbf16>, vector<8x512xf32> -> vector<8x512xf32>
    %c0_3 = arith.constant 0 : index
    %c0_4 = arith.constant 0 : index
    %4 = vector.load %arg3[%c0_3, %c0_4] : memref<1x512xf32, #tpu.memory_space<vmem>>, vector<1x512xf32>
    %5 = vector.broadcast %4 : vector<1x512xf32> to vector<8x512xf32>
    %6 = arith.addf %3, %5 : vector<8x512xf32>
    %cst_5 = arith.constant 0.000000e+00 : f32
    %7 = vector.broadcast %cst_5 : f32 to vector<8x512xf32>
    %8 = arith.maximumf %6, %7 : vector<8x512xf32>
    %9 = vector.extract_strided_slice %8 {offsets = [0, 0], sizes = [8, 256], strides = [1, 1]} : vector<8x512xf32> to vector<8x256xf32>
    %c0_6 = arith.constant 0 : index
    %c0_7 = arith.constant 0 : index
    %10 = vector.load %arg13[%c0_6, %c0_7] : memref<16x256xf32, #tpu.memory_space<vmem>>, vector<8x256xf32>
    tpu.vector_store %arg13[%c0_6, %c0_7], %9 {strides = array<i32>} : memref<16x256xf32, #tpu.memory_space<vmem>>, vector<8x256xf32>,
    %11 = vector.extract_strided_slice %8 {offsets = [0, 256], sizes = [8, 256], strides = [1, 1]} : vector<8x512xf32> to vector<8x256xf32>
    %c8 = arith.constant 8 : index
    %c0_8 = arith.constant 0 : index
    %12 = vector.load %arg13[%c8, %c0_8] : memref<16x256xf32, #tpu.memory_space<vmem>>, vector<8x256xf32>
    tpu.vector_store %arg13[%c8, %c0_8], %11 {strides = array<i32>} : memref<16x256xf32, #tpu.memory_space<vmem>>, vector<8x256xf32>,
    %c0_9 = arith.constant 0 : index
    %c0_10 = arith.constant 0 : index
    %13 = vector.load %arg13[%c0_9, %c0_10] : memref<16x256xf32, #tpu.memory_space<vmem>>, vector<16x256xf32>
    %14 = arith.truncf %13 : vector<16x256xf32> to vector<16x256xbf16>
    %c0_11 = arith.constant 0 : index
    %c0_12 = arith.constant 0 : index
    %15 = vector.load %arg4[%c0_11, %c0_12] : memref<256x512xbf16, #tpu.memory_space<vmem>>, vector<256x512xbf16>
    %cst_13 = arith.constant dense<0.000000e+00> : vector<16x512xf32>
    %16 = tpu.matmul %14, %15, %cst_13 {dimension_numbers = #tpu.dot_dimension_numbers<[1], [0], [0], [1], [0, 0, 1, 1], [], []>} : vector<16x256xbf16>, vector<256x512xbf16>, vector<16x512xf32> -> vector<16x512xf32>
    %17 = vector.extract_strided_slice %16 {offsets = [0, 0], sizes = [8, 256], strides = [1, 1]} : vector<16x512xf32> to vector<8x256xf32>
    %c0_14 = arith.constant 0 : index
    %c0_15 = arith.constant 0 : index
    %18 = vector.load %arg14[%c0_14, %c0_15] : memref<32x256xf32, #tpu.memory_space<vmem>>, vector<8x256xf32>
    tpu.vector_store %arg14[%c0_14, %c0_15], %17 {strides = array<i32>} : memref<32x256xf32, #tpu.memory_space<vmem>>, vector<8x256xf32>,
    %19 = vector.extract_strided_slice %16 {offsets = [0, 256], sizes = [8, 256], strides = [1, 1]} : vector<16x512xf32> to vector<8x256xf32>
    %c8_16 = arith.constant 8 : index
    %c0_17 = arith.constant 0 : index
    %20 = vector.load %arg14[%c8_16, %c0_17] : memref<32x256xf32, #tpu.memory_space<vmem>>, vector<8x256xf32>
    tpu.vector_store %arg14[%c8_16, %c0_17], %19 {strides = array<i32>} : memref<32x256xf32, #tpu.memory_space<vmem>>, vector<8x256xf32>,
    %21 = vector.extract_strided_slice %16 {offsets = [8, 0], sizes = [8, 256], strides = [1, 1]} : vector<16x512xf32> to vector<8x256xf32>
    %c16 = arith.constant 16 : index
    %c0_18 = arith.constant 0 : index
    %22 = vector.load %arg14[%c16, %c0_18] : memref<32x256xf32, #tpu.memory_space<vmem>>, vector<8x256xf32>
    tpu.vector_store %arg14[%c16, %c0_18], %21 {strides = array<i32>} : memref<32x256xf32, #tpu.memory_space<vmem>>, vector<8x256xf32>,
    %23 = vector.extract_strided_slice %16 {offsets = [8, 256], sizes = [8, 256], strides = [1, 1]} : vector<16x512xf32> to vector<8x256xf32>
    %c24 = arith.constant 24 : index
    %c0_19 = arith.constant 0 : index
    %24 = vector.load %arg14[%c24, %c0_19] : memref<32x256xf32, #tpu.memory_space<vmem>>, vector<8x256xf32>
    tpu.vector_store %arg14[%c24, %c0_19], %23 {strides = array<i32>} : memref<32x256xf32, #tpu.memory_space<vmem>>, vector<8x256xf32>,
    %c0_20 = arith.constant 0 : index
    %c0_21 = arith.constant 0 : index
    %25 = vector.load %arg14[%c0_20, %c0_21] : memref<32x256xf32, #tpu.memory_space<vmem>>, vector<32x256xf32>
    %c0_22 = arith.constant 0 : index
    %c0_23 = arith.constant 0 : index
    %26 = vector.load %arg5[%c0_22, %c0_23] : memref<1x256xf32, #tpu.memory_space<vmem>>, vector<1x256xf32>
    %27 = vector.broadcast %26 : vector<1x256xf32> to vector<32x256xf32>
    %28 = arith.addf %25, %27 : vector<32x256xf32>
    %cst_24 = arith.constant 0.000000e+00 : f32
    %29 = vector.broadcast %cst_24 : f32 to vector<32x256xf32>
    %30 = arith.cmpf oge, %28, %29 : vector<32x256xf32>
    %cst_25 = arith.constant 0.00999999977 : f32
    %31 = vector.broadcast %cst_25 : f32 to vector<32x256xf32>
    %32 = arith.mulf %31, %28 : vector<32x256xf32>
    %33 = arith.select %30, %28, %32 : vector<32x256xi1>, vector<32x256xf32>
    %34 = arith.truncf %33 : vector<32x256xf32> to vector<32x256xbf16>
    %c0_26 = arith.constant 0 : index
    %c0_27 = arith.constant 0 : index
    %35 = vector.load %arg6[%c0_26, %c0_27] : memref<256x768xbf16, #tpu.memory_space<vmem>>, vector<256x768xbf16>
    %cst_28 = arith.constant dense<0.000000e+00> : vector<32x768xf32>
    %36 = tpu.matmul %34, %35, %cst_28 {dimension_numbers = #tpu.dot_dimension_numbers<[1], [0], [0], [1], [0, 0, 1, 1], [], []>} : vector<32x256xbf16>, vector<256x768xbf16>, vector<32x768xf32> -> vector<32x768xf32>
    %cst_29 = arith.constant 0.000000e+00 : f32
    %37 = vector.broadcast %cst_29 : f32 to vector<48x256xf32>
    %c0_30 = arith.constant 0 : index
    %c0_31 = arith.constant 0 : index
    %38 = vector.load %arg15[%c0_30, %c0_31] : memref<48x256xf32, #tpu.memory_space<vmem>>, vector<48x256xf32>
    tpu.vector_store %arg15[%c0_30, %c0_31], %37 {strides = array<i32>} : memref<48x256xf32, #tpu.memory_space<vmem>>, vector<48x256xf32>,
    %c0_32 = arith.constant 0 : index
    %c0_33 = arith.constant 0 : index
    %39 = vector.load %arg15[%c0_32, %c0_33] : memref<48x256xf32, #tpu.memory_space<vmem>>, vector<32x256xf32>
    %40 = vector.extract_strided_slice %36 {offsets = [0, 0], sizes = [32, 256], strides = [1, 1]} : vector<32x768xf32> to vector<32x256xf32>
    %41 = arith.addf %39, %40 : vector<32x256xf32>
    %c0_34 = arith.constant 0 : index
    %c0_35 = arith.constant 0 : index
    %42 = vector.load %arg15[%c0_34, %c0_35] : memref<48x256xf32, #tpu.memory_space<vmem>>, vector<32x256xf32>
    tpu.vector_store %arg15[%c0_34, %c0_35], %41 {strides = array<i32>} : memref<48x256xf32, #tpu.memory_space<vmem>>, vector<32x256xf32>,
    %c8_36 = arith.constant 8 : index
    %c0_37 = arith.constant 0 : index
    %43 = vector.load %arg15[%c8_36, %c0_37] : memref<48x256xf32, #tpu.memory_space<vmem>>, vector<32x256xf32>
    %44 = vector.extract_strided_slice %36 {offsets = [0, 256], sizes = [32, 256], strides = [1, 1]} : vector<32x768xf32> to vector<32x256xf32>
    %45 = arith.addf %43, %44 : vector<32x256xf32>
    %c8_38 = arith.constant 8 : index
    %c0_39 = arith.constant 0 : index
    %46 = vector.load %arg15[%c8_38, %c0_39] : memref<48x256xf32, #tpu.memory_space<vmem>>, vector<32x256xf32>
    tpu.vector_store %arg15[%c8_38, %c0_39], %45 {strides = array<i32>} : memref<48x256xf32, #tpu.memory_space<vmem>>, vector<32x256xf32>,
    %c16_40 = arith.constant 16 : index
    %c0_41 = arith.constant 0 : index
    %47 = vector.load %arg15[%c16_40, %c0_41] : memref<48x256xf32, #tpu.memory_space<vmem>>, vector<32x256xf32>
    %48 = vector.extract_strided_slice %36 {offsets = [0, 512], sizes = [32, 256], strides = [1, 1]} : vector<32x768xf32> to vector<32x256xf32>
    %49 = arith.addf %47, %48 : vector<32x256xf32>
    %c16_42 = arith.constant 16 : index
    %c0_43 = arith.constant 0 : index
    %50 = vector.load %arg15[%c16_42, %c0_43] : memref<48x256xf32, #tpu.memory_space<vmem>>, vector<32x256xf32>
    tpu.vector_store %arg15[%c16_42, %c0_43], %49 {strides = array<i32>} : memref<48x256xf32, #tpu.memory_space<vmem>>, vector<32x256xf32>,
    %c0_44 = arith.constant 0 : index
    %c0_45 = arith.constant 0 : index
    %51 = vector.load %arg15[%c0_44, %c0_45] : memref<48x256xf32, #tpu.memory_space<vmem>>, vector<48x256xf32>
    %c0_46 = arith.constant 0 : index
    %c0_47 = arith.constant 0 : index
    %52 = vector.load %arg7[%c0_46, %c0_47] : memref<1x256xf32, #tpu.memory_space<vmem>>, vector<1x256xf32>
    %53 = vector.broadcast %52 : vector<1x256xf32> to vector<48x256xf32>
    %54 = arith.addf %51, %53 : vector<48x256xf32>
    %cst_48 = arith.constant 0.000000e+00 : f32
    %55 = vector.broadcast %cst_48 : f32 to vector<48x256xf32>
    %56 = arith.cmpf oge, %54, %55 : vector<48x256xf32>
    %cst_49 = arith.constant 0.00999999977 : f32
    %57 = vector.broadcast %cst_49 : f32 to vector<48x256xf32>
    %58 = arith.mulf %57, %54 : vector<48x256xf32>
    %59 = arith.select %56, %54, %58 : vector<48x256xi1>, vector<48x256xf32>
    %60 = arith.truncf %59 : vector<48x256xf32> to vector<48x256xbf16>
    %c0_50 = arith.constant 0 : index
    %c0_51 = arith.constant 0 : index
    %61 = vector.load %arg8[%c0_50, %c0_51] : memref<256x768xbf16, #tpu.memory_space<vmem>>, vector<256x768xbf16>
    %cst_52 = arith.constant dense<0.000000e+00> : vector<48x768xf32>
    %62 = tpu.matmul %60, %61, %cst_52 {dimension_numbers = #tpu.dot_dimension_numbers<[1], [0], [0], [1], [0, 0, 1, 1], [], []>} : vector<48x256xbf16>, vector<256x768xbf16>, vector<48x768xf32> -> vector<48x768xf32>
    %cst_53 = arith.constant 0.000000e+00 : f32
    %63 = vector.broadcast %cst_53 : f32 to vector<64x256xf32>
    %c0_54 = arith.constant 0 : index
    %c0_55 = arith.constant 0 : index
    %64 = vector.load %arg16[%c0_54, %c0_55] : memref<64x256xf32, #tpu.memory_space<vmem>>, vector<64x256xf32>
    tpu.vector_store %arg16[%c0_54, %c0_55], %63 {strides = array<i32>} : memref<64x256xf32, #tpu.memory_space<vmem>>, vector<64x256xf32>,
    %c0_56 = arith.constant 0 : index
    %c0_57 = arith.constant 0 : index
    %65 = vector.load %arg16[%c0_56, %c0_57] : memref<64x256xf32, #tpu.memory_space<vmem>>, vector<48x256xf32>
    %66 = vector.extract_strided_slice %62 {offsets = [0, 0], sizes = [48, 256], strides = [1, 1]} : vector<48x768xf32> to vector<48x256xf32>
    %67 = arith.addf %65, %66 : vector<48x256xf32>
    %c0_58 = arith.constant 0 : index
    %c0_59 = arith.constant 0 : index
    %68 = vector.load %arg16[%c0_58, %c0_59] : memref<64x256xf32, #tpu.memory_space<vmem>>, vector<48x256xf32>
    tpu.vector_store %arg16[%c0_58, %c0_59], %67 {strides = array<i32>} : memref<64x256xf32, #tpu.memory_space<vmem>>, vector<48x256xf32>,
    %c8_60 = arith.constant 8 : index
    %c0_61 = arith.constant 0 : index
    %69 = vector.load %arg16[%c8_60, %c0_61] : memref<64x256xf32, #tpu.memory_space<vmem>>, vector<48x256xf32>
    %70 = vector.extract_strided_slice %62 {offsets = [0, 256], sizes = [48, 256], strides = [1, 1]} : vector<48x768xf32> to vector<48x256xf32>
    %71 = arith.addf %69, %70 : vector<48x256xf32>
    %c8_62 = arith.constant 8 : index
    %c0_63 = arith.constant 0 : index
    %72 = vector.load %arg16[%c8_62, %c0_63] : memref<64x256xf32, #tpu.memory_space<vmem>>, vector<48x256xf32>
    tpu.vector_store %arg16[%c8_62, %c0_63], %71 {strides = array<i32>} : memref<64x256xf32, #tpu.memory_space<vmem>>, vector<48x256xf32>,
    %c16_64 = arith.constant 16 : index
    %c0_65 = arith.constant 0 : index
    %73 = vector.load %arg16[%c16_64, %c0_65] : memref<64x256xf32, #tpu.memory_space<vmem>>, vector<48x256xf32>
    %74 = vector.extract_strided_slice %62 {offsets = [0, 512], sizes = [48, 256], strides = [1, 1]} : vector<48x768xf32> to vector<48x256xf32>
    %75 = arith.addf %73, %74 : vector<48x256xf32>
    %c16_66 = arith.constant 16 : index
    %c0_67 = arith.constant 0 : index
    %76 = vector.load %arg16[%c16_66, %c0_67] : memref<64x256xf32, #tpu.memory_space<vmem>>, vector<48x256xf32>
    tpu.vector_store %arg16[%c16_66, %c0_67], %75 {strides = array<i32>} : memref<64x256xf32, #tpu.memory_space<vmem>>, vector<48x256xf32>,
    %c0_68 = arith.constant 0 : index
    %c0_69 = arith.constant 0 : index
    %77 = vector.load %arg16[%c0_68, %c0_69] : memref<64x256xf32, #tpu.memory_space<vmem>>, vector<64x256xf32>
    %c0_70 = arith.constant 0 : index
    %c0_71 = arith.constant 0 : index
    %78 = vector.load %arg9[%c0_70, %c0_71] : memref<1x256xf32, #tpu.memory_space<vmem>>, vector<1x256xf32>
    %79 = vector.broadcast %78 : vector<1x256xf32> to vector<64x256xf32>
    %80 = arith.addf %77, %79 : vector<64x256xf32>
    %cst_72 = arith.constant 0.000000e+00 : f32
    %81 = vector.broadcast %cst_72 : f32 to vector<64x256xf32>
    %82 = arith.cmpf oge, %80, %81 : vector<64x256xf32>
    %cst_73 = arith.constant 0.00999999977 : f32
    %83 = vector.broadcast %cst_73 : f32 to vector<64x256xf32>
    %84 = arith.mulf %83, %80 : vector<64x256xf32>
    %85 = arith.select %82, %80, %84 : vector<64x256xi1>, vector<64x256xf32>
    %86 = arith.truncf %85 : vector<64x256xf32> to vector<64x256xbf16>
    %c0_74 = arith.constant 0 : index
    %c0_75 = arith.constant 0 : index
    %87 = vector.load %arg10[%c0_74, %c0_75] : memref<256x384xbf16, #tpu.memory_space<vmem>>, vector<256x384xbf16>
    %cst_76 = arith.constant dense<0.000000e+00> : vector<64x384xf32>
    %88 = tpu.matmul %86, %87, %cst_76 {dimension_numbers = #tpu.dot_dimension_numbers<[1], [0], [0], [1], [0, 0, 1, 1], [], []>} : vector<64x256xbf16>, vector<256x384xbf16>, vector<64x384xf32> -> vector<64x384xf32>
    %cst_77 = arith.constant 0.000000e+00 : f32
    %89 = vector.broadcast %cst_77 : f32 to vector<80x128xf32>
    %c0_78 = arith.constant 0 : index
    %c0_79 = arith.constant 0 : index
    %90 = vector.load %arg17[%c0_78, %c0_79] : memref<80x128xf32, #tpu.memory_space<vmem>>, vector<80x128xf32>
    tpu.vector_store %arg17[%c0_78, %c0_79], %89 {strides = array<i32>} : memref<80x128xf32, #tpu.memory_space<vmem>>, vector<80x128xf32>,
    %c0_80 = arith.constant 0 : index
    %c0_81 = arith.constant 0 : index
    %91 = vector.load %arg17[%c0_80, %c0_81] : memref<80x128xf32, #tpu.memory_space<vmem>>, vector<64x128xf32>
    %92 = vector.extract_strided_slice %88 {offsets = [0, 0], sizes = [64, 128], strides = [1, 1]} : vector<64x384xf32> to vector<64x128xf32>
    %93 = arith.addf %91, %92 : vector<64x128xf32>
    %c0_82 = arith.constant 0 : index
    %c0_83 = arith.constant 0 : index
    %94 = vector.load %arg17[%c0_82, %c0_83] : memref<80x128xf32, #tpu.memory_space<vmem>>, vector<64x128xf32>
    tpu.vector_store %arg17[%c0_82, %c0_83], %93 {strides = array<i32>} : memref<80x128xf32, #tpu.memory_space<vmem>>, vector<64x128xf32>,
    %c8_84 = arith.constant 8 : index
    %c0_85 = arith.constant 0 : index
    %95 = vector.load %arg17[%c8_84, %c0_85] : memref<80x128xf32, #tpu.memory_space<vmem>>, vector<64x128xf32>
    %96 = vector.extract_strided_slice %88 {offsets = [0, 128], sizes = [64, 128], strides = [1, 1]} : vector<64x384xf32> to vector<64x128xf32>
    %97 = arith.addf %95, %96 : vector<64x128xf32>
    %c8_86 = arith.constant 8 : index
    %c0_87 = arith.constant 0 : index
    %98 = vector.load %arg17[%c8_86, %c0_87] : memref<80x128xf32, #tpu.memory_space<vmem>>, vector<64x128xf32>
    tpu.vector_store %arg17[%c8_86, %c0_87], %97 {strides = array<i32>} : memref<80x128xf32, #tpu.memory_space<vmem>>, vector<64x128xf32>,
    %c16_88 = arith.constant 16 : index
    %c0_89 = arith.constant 0 : index
    %99 = vector.load %arg17[%c16_88, %c0_89] : memref<80x128xf32, #tpu.memory_space<vmem>>, vector<64x128xf32>
    %100 = vector.extract_strided_slice %88 {offsets = [0, 256], sizes = [64, 128], strides = [1, 1]} : vector<64x384xf32> to vector<64x128xf32>
    %101 = arith.addf %99, %100 : vector<64x128xf32>
    %c16_90 = arith.constant 16 : index
    %c0_91 = arith.constant 0 : index
    %102 = vector.load %arg17[%c16_90, %c0_91] : memref<80x128xf32, #tpu.memory_space<vmem>>, vector<64x128xf32>
    tpu.vector_store %arg17[%c16_90, %c0_91], %101 {strides = array<i32>} : memref<80x128xf32, #tpu.memory_space<vmem>>, vector<64x128xf32>,
    %c0_92 = arith.constant 0 : index
    %c0_93 = arith.constant 0 : index
    %103 = vector.load %arg17[%c0_92, %c0_93] : memref<80x128xf32, #tpu.memory_space<vmem>>, vector<80x128xf32>
    %c0_94 = arith.constant 0 : index
    %c0_95 = arith.constant 0 : index
    %104 = vector.load %arg11[%c0_94, %c0_95] : memref<1x128xf32, #tpu.memory_space<vmem>>, vector<1x128xf32>
    %105 = vector.broadcast %104 : vector<1x128xf32> to vector<80x128xf32>
    %106 = arith.addf %103, %105 : vector<80x128xf32>
    %107 = arith.negf %106 : vector<80x128xf32>
    %108 = math.exp %107 : vector<80x128xf32>
    %cst_96 = arith.constant 1.000000e+00 : f32
    %109 = vector.broadcast %cst_96 : f32 to vector<80x128xf32>
    %110 = arith.addf %109, %108 : vector<80x128xf32>
    %111 = arith.divf %109, %110 : vector<80x128xf32>
    %112 = vector.shape_cast %111 : vector<80x128xf32> to vector<10x8x128xf32>
    %113 = vector.extract_strided_slice %112 {offsets = [0, 0, 0], sizes = [10, 8, 42], strides = [1, 1, 1]} : vector<10x8x128xf32> to vector<10x8x42xf32>
    %c0_97 = arith.constant 0 : index
    %c0_98 = arith.constant 0 : index
    %c0_99 = arith.constant 0 : index
    %114 = vector.load %arg12[%c0_97, %c0_98, %c0_99] : memref<10x8x42xf32, #tpu.memory_space<vmem>>, vector<10x8x42xf32>
    tpu.vector_store %arg12[%c0_97, %c0_98, %c0_99], %113 {strides = array<i32>} : memref<10x8x42xf32, #tpu.memory_space<vmem>>, vector<10x8x42xf32>,
    return
  }
  func.func @transform_0(%arg0: i32) -> (i32, i32) {
    %c0_i32 = arith.constant 0 : i32
    %c0_i32_0 = arith.constant 0 : i32
    return %arg0, %c0_i32 : i32, i32
  }
  func.func @transform_1(%arg0: i32) -> (i32, i32) {
    %c0_i32 = arith.constant 0 : i32
    %c0_i32_0 = arith.constant 0 : i32
    %c0_i32_1 = arith.constant 0 : i32
    return %c0_i32, %c0_i32_0 : i32, i32
  }
  func.func @transform_2(%arg0: i32) -> (i32, i32) {
    %c0_i32 = arith.constant 0 : i32
    %c0_i32_0 = arith.constant 0 : i32
    %c0_i32_1 = arith.constant 0 : i32
    return %c0_i32, %c0_i32_0 : i32, i32
  }
  func.func @transform_3(%arg0: i32) -> (i32, i32) {
    %c0_i32 = arith.constant 0 : i32
    %c0_i32_0 = arith.constant 0 : i32
    %c0_i32_1 = arith.constant 0 : i32
    return %c0_i32, %c0_i32_0 : i32, i32
  }
  func.func @transform_4(%arg0: i32) -> (i32, i32) {
    %c0_i32 = arith.constant 0 : i32
    %c0_i32_0 = arith.constant 0 : i32
    %c0_i32_1 = arith.constant 0 : i32
    return %c0_i32, %c0_i32_0 : i32, i32
  }
  func.func @transform_5(%arg0: i32) -> (i32, i32) {
    %c0_i32 = arith.constant 0 : i32
    %c0_i32_0 = arith.constant 0 : i32
    %c0_i32_1 = arith.constant 0 : i32
    return %c0_i32, %c0_i32_0 : i32, i32
  }
  func.func @transform_6(%arg0: i32) -> (i32, i32) {
    %c0_i32 = arith.constant 0 : i32
    %c0_i32_0 = arith.constant 0 : i32
    %c0_i32_1 = arith.constant 0 : i32
    return %c0_i32, %c0_i32_0 : i32, i32
  }
  func.func @transform_7(%arg0: i32) -> (i32, i32) {
    %c0_i32 = arith.constant 0 : i32
    %c0_i32_0 = arith.constant 0 : i32
    %c0_i32_1 = arith.constant 0 : i32
    return %c0_i32, %c0_i32_0 : i32, i32
  }
  func.func @transform_8(%arg0: i32) -> (i32, i32) {
    %c0_i32 = arith.constant 0 : i32
    %c0_i32_0 = arith.constant 0 : i32
    %c0_i32_1 = arith.constant 0 : i32
    return %c0_i32, %c0_i32_0 : i32, i32
  }
  func.func @transform_9(%arg0: i32) -> (i32, i32) {
    %c0_i32 = arith.constant 0 : i32
    %c0_i32_0 = arith.constant 0 : i32
    %c0_i32_1 = arith.constant 0 : i32
    return %c0_i32, %c0_i32_0 : i32, i32
  }
  func.func @transform_10(%arg0: i32) -> (i32, i32) {
    %c0_i32 = arith.constant 0 : i32
    %c0_i32_0 = arith.constant 0 : i32
    %c0_i32_1 = arith.constant 0 : i32
    return %c0_i32, %c0_i32_0 : i32, i32
  }
  func.func @transform_11(%arg0: i32) -> (i32, i32, i32) {
    %c0_i32 = arith.constant 0 : i32
    %c0_i32_0 = arith.constant 0 : i32
    %c0_i32_1 = arith.constant 0 : i32
    return %c0_i32, %arg0, %c0_i32_0 : i32, i32, i32
  }
}

</mosaic_0001>

<bundles_post_ra>
// kernel: generator_cnn_forward.1
= control target key start
LH: loop header
LB: loop body
LE: loop exit
PB: predicated region body
PF: predicated region fallthrough
CT: control target
= control target key end

     0   :  { %16 = vsyncpa [#allocation8], 0  ;;  %s4647_s0 = inlined_call_operand.vmem [shape: f32[8,32], index: 0, kind: input, shape index: {}]   ;;  %s4648_s1 = inlined_call_operand.hbm [shape: bf16[32,512], index: 1, kind: input, shape index: {}]   ;;  %s4649_s2 = inlined_call_operand.vmem [shape: f32[1,512], index: 2, kind: input, shape index: {}]   ;;  %s4650_s3 = inlined_call_operand.hbm [shape: bf16[256,512], index: 3, kind: input, shape index: {}]   ;;  %s4651_s4 = inlined_call_operand.vmem [shape: f32[1,256], index: 4, kind: input, shape index: {}]   ;;  %s4652_s5 = inlined_call_operand.hbm [shape: bf16[256,768], index: 5, kind: input, shape index: {}]   ;;  %s4653_s6 = inlined_call_operand.vmem [shape: f32[1,256], index: 6, kind: input, shape index: {}]   ;;  %s4654_s7 = inlined_call_operand.hbm [shape: bf16[256,768], index: 7, kind: input, shape index: {}]   ;;  %s4655_s8 = inlined_call_operand.vmem [shape: f32[1,256], index: 8, kind: input, shape index: {}]   ;;  %s4656_s9 = inlined_call_operand.hbm [shape: bf16[256,384], index: 9, kind: input, shape index: {}]   ;;  %s4657_s10 = inlined_call_operand.vmem [shape: f32[1,128], index: 10, kind: input, shape index: {}]   ;;  %s4658_s11 = inlined_call_operand.vmem [shape: f32[10,8,42], index: 11, kind: output, shape index: {}]  }
   0x1   :  { %17 = vsyncpa [#allocation10], 0 }
   0x2   :  { %18 = vsyncpa [#allocation13], 0  ;;  %s4337_s17 = smov [#allocation9]   ;;  %s4221_s21 = scalar_lea.hbm %s4650_s3, 8192 }
   0x3   :  { %s40_s18 = sshll.u32 %s4337_s17, 4  ;;  %p4222_p0 = scmp.ne.s32.totalorder %s4650_s3, %s4221_s21  ;;  %s41_s18 = int_to_ptr.vmem [resolvable:$true] %s40_s18 }
   0x4   :  { %p4225_p1 = scmp.lt.u32.totalorder %s4221_s21, %s4650_s3 }
   0x6   :  { %p4227_p2 = pnand %p4225_p1, %p4222_p0 }
   0x8   :  { %4230 = shalt.err (!%p4227_p2)
}
   0x9   :  { %s4231_s26 = scalar_lea.vmem %s41_s18, 8192  ;;  %p4236_p4 = scmp.lt.s32.totalorder %s41_s18, %s41_s18 }
   0xa   :  { %p4232_p3 = scmp.ne.s32.totalorder %s41_s18, %s4231_s26  ;;  %p4237_p5 = scmp.lt.s32.totalorder %s4231_s26, %s4231_s26 }
   0xc   :  { %p4238_p6 = por %p4237_p5, %p4236_p4 }
   0xe   :  { %p4239_p7 = pnand %p4238_p6, %p4232_p3 }
  0x10   :  { %4242 = shalt.err (!%p4239_p7)
}
  0x11   :  { %s4338_s27 = smov 256   ;;  %s4339_s28 = smov 16  }
  0x12   :  { %46 = dma.hbm_to_vmem [thread:$0]  %s4650_s3, 8192, %s41_s18, [#allocation10], %s4338_s27, %s4338_s27, %s4339_s28  }
  0x13   :  { %s4340_s12 = smov [#allocation12]   ;;  %s4341_s14 = smov [#allocation7]  }
  0x14   :  { %s68_s13 = sshll.u32 %s4340_s12, 4  ;;  %s26_s15 = sshll.u32 %s4341_s14, 4  ;;  %s69_s13 = int_to_ptr.vmem [resolvable:$true] %s68_s13  ;;  %s27_s15 = int_to_ptr.vmem [resolvable:$true] %s26_s15 }
  0x15   :  { %s4243_s19 = scalar_lea.hbm %s4654_s7, 12288 }
  0x16   :  { %p4244_p8 = scmp.ne.s32.totalorder %s4654_s7, %s4243_s19  ;;  %p4247_p9 = scmp.lt.u32.totalorder %s4243_s19, %s4654_s7 }
  0x18   :  { %p4249_p10 = pnand %p4247_p9, %p4244_p8 }
  0x1a   :  { %4252 = shalt.err (!%p4249_p10)
}
  0x1b   :  { %s4253_s3 = scalar_lea.vmem %s69_s13, 12288  ;;  %p4258_p12 = scmp.lt.s32.totalorder %s69_s13, %s69_s13 }
  0x1c   :  { %p4254_p11 = scmp.ne.s32.totalorder %s69_s13, %s4253_s3  ;;  %p4259_p13 = scmp.lt.s32.totalorder %s4253_s3, %s4253_s3 }
  0x1e   :  { %p4260_p0 = por %p4259_p13, %p4258_p12 }
  0x20   :  { %p4261_p1 = pnand %p4260_p0, %p4254_p11 }
  0x22   :  { %4264 = shalt.err (!%p4261_p1)
}
  0x23   :  { %s4342_s18 = smov 384   ;;  %s4343_s24 = smov 24  }
  0x24   :  { %74 = dma.hbm_to_vmem [thread:$0]  %s4654_s7, 12288, %s69_s13, [#allocation13], %s4342_s18, %s4342_s18, %s4343_s24  }
  0x25   :  { %s4265_s12 = scalar_lea.hbm %s4648_s1, 1024 }
  0x26   :  { %p4266_p2 = scmp.ne.s32.totalorder %s4648_s1, %s4265_s12  ;;  %p4269_p3 = scmp.lt.u32.totalorder %s4265_s12, %s4648_s1 }
  0x28   :  { %p4271_p4 = pnand %p4269_p3, %p4266_p2 }
  0x2a   :  { %4274 = shalt.err (!%p4271_p4)
}
  0x2b   :  { %s4275_s20 = scalar_lea.vmem %s27_s15, 1024  ;;  %p4280_p6 = scmp.lt.s32.totalorder %s27_s15, %s27_s15 }
  0x2c   :  { %p4276_p5 = scmp.ne.s32.totalorder %s27_s15, %s4275_s20  ;;  %p4281_p7 = scmp.lt.s32.totalorder %s4275_s20, %s4275_s20 }
  0x2e   :  { %p4282_p8 = por %p4281_p7, %p4280_p6 }
  0x30   :  { %p4283_p9 = pnand %p4282_p8, %p4276_p5 }
  0x32   :  { %4286 = shalt.err (!%p4283_p9)
}
  0x33   :  { %32 = dma.hbm_to_vmem [thread:$0]  %s4648_s1, 1024, %s27_s15, [#allocation8], %s4338_s27, %s4338_s27, %s4339_s28  }
  0x34   :  { %s4344_s21 = smov [#allocation11]   ;;  %s4345_s23 = smov [#allocation14]  }
  0x35   :  { %s54_s22 = sshll.u32 %s4344_s21, 4  ;;  %s82_s3 = sshll.u32 %s4345_s23, 4  ;;  %s55_s22 = int_to_ptr.vmem [resolvable:$true] %s54_s22  ;;  %s83_s3 = int_to_ptr.vmem [resolvable:$true] %s82_s3 }
  0x36   :  { %s4287_s29 = scalar_lea.hbm %s4652_s5, 12288 }
  0x37   :  { %p4288_p10 = scmp.ne.s32.totalorder %s4652_s5, %s4287_s29  ;;  %p4291_p11 = scmp.lt.u32.totalorder %s4287_s29, %s4652_s5 }
  0x39   :  { %p4293_p12 = pnand %p4291_p11, %p4288_p10 }
  0x3b   :  { %4296 = shalt.err (!%p4293_p12)
}
  0x3c   :  { %s4297_s1 = scalar_lea.vmem %s55_s22, 12288  ;;  %p4302_p0 = scmp.lt.s32.totalorder %s55_s22, %s55_s22 }
  0x3d   :  { %p4298_p13 = scmp.ne.s32.totalorder %s55_s22, %s4297_s1  ;;  %p4303_p1 = scmp.lt.s32.totalorder %s4297_s1, %s4297_s1 }
  0x3f   :  { %p4304_p2 = por %p4303_p1, %p4302_p0 }
  0x41   :  { %p4305_p3 = pnand %p4304_p2, %p4298_p13 }
  0x43   :  { %4308 = shalt.err (!%p4305_p3)
}
  0x44   :  { %60 = dma.hbm_to_vmem [thread:$0]  %s4652_s5, 12288, %s55_s22, [#allocation10], %s4342_s18, %s4342_s18, %s4343_s24  }
  0x45   :  { %s4309_s19 = scalar_lea.hbm %s4656_s9, 6144 }
  0x46   :  { %p4310_p4 = scmp.ne.s32.totalorder %s4656_s9, %s4309_s19  ;;  %p4313_p5 = scmp.lt.u32.totalorder %s4309_s19, %s4656_s9 }
  0x48   :  { %p4315_p6 = pnand %p4313_p5, %p4310_p4 }
  0x4a   :  { %4318 = shalt.err (!%p4315_p6)
}
  0x4b   :  { %s4319_s23 = scalar_lea.vmem %s83_s3, 6144  ;;  %p4324_p8 = scmp.lt.s32.totalorder %s83_s3, %s83_s3 }
  0x4c   :  { %p4320_p7 = scmp.ne.s32.totalorder %s83_s3, %s4319_s23  ;;  %p4325_p9 = scmp.lt.s32.totalorder %s4319_s23, %s4319_s23 }
  0x4e   :  { %p4326_p10 = por %p4325_p9, %p4324_p8 }
  0x50   :  { %p4327_p11 = pnand %p4326_p10, %p4320_p7 }
  0x52   :  { %4330 = shalt.err (!%p4327_p11)
}
  0x53   :  { %s4346_s5 = smov 192   ;;  %s4347_s18 = smov 12  }
  0x54   :  { %88 = dma.hbm_to_vmem [thread:$0]  %s4656_s9, 6144, %s83_s3, [#allocation13], %s4346_s5, %s4346_s5, %s4347_s18  }
  0x55   :  { %4331 = dma.done.wait [#allocation8], 1024  }
  0x56   :  { %4332 = vsyncadd [#allocation8], 4294966272 }
  0x57   :  { %4333 = dma.done.wait [#allocation10], 20480  }
  0x58   :  { %4334 = vsyncadd [#allocation10], 4294946816 }
  0x59   :  { %4335 = dma.done.wait [#allocation13], 18432  }
  0x5a   :  { %4336 = vsyncadd [#allocation13], 4294948864  ;;  %v4348_v0 = vmov 0   ;;  %v3721_v1 = vld [vmem:[#allocation7 + $0x4] ss:$16 sps:$4 sm:$0xff]   ;;  %vm179_vm0 = vcmask 261120  }
  0x5b   :  { %215 = vmatprep.mubr.bf16.mxu1 %v4348_v0  ;;  %v3723_v2 = vld [vmem:[#allocation7] ss:$16 sps:$4 sm:$0xff]   ;;  %183 = vmatprep.subr.bf16.mxu1 %v3721_v1  ;;  %v3724_v3 = vld [vmem:[#allocation7 + $0x24] ss:$16 sps:$4 sm:$0xff]   ;;  %v3729_v6 = vld [vmem:[#allocation7 + $0xc] ss:$16 sps:$4 sm:$0xff]  }
  0x5c   :  { %v3726_v4 = vld [vmem:[#allocation7 + $0x20] ss:$16 sps:$4 sm:$0xff]   ;;  %184 = vmatpush1.bf16.msra.mxu1 %v3723_v2  ;;  %v3733_v8 = vld [vmem:[#allocation9 + $0x4] ss:$16 sps:$4 sm:$0xff]   ;;  %v3727_v9 = vld [vmem:[#allocation7 + $0x8] ss:$16 sps:$4 sm:$0xff]  }
  0x5d   :  { %v107_v5 = vld [vmem:[%s4647_s0] sm:$0xff]  ;;  %185 = vmatprep.subr.bf16.mxu1 %v3724_v3  ;;  %v3732_v10 = vld [vmem:[#allocation7 + $0x2c] ss:$16 sps:$4 sm:$0xff]   ;;  %663 = vmatprep.subr.bf16.mxu0 %v3733_v8  ;;  %v3730_v13 = vld [vmem:[#allocation7 + $0x28] ss:$16 sps:$4 sm:$0xff]  }
  0x5e   :  { %v108_v7 = vpack.c.bf16 %v107_v5, %v107_v5  ;;  %v3738_v11 = vld [vmem:[#allocation9] ss:$16 sps:$4 sm:$0xff]   ;;  %v3739_v12 = vld [vmem:[#allocation9 + $0x24] ss:$16 sps:$4 sm:$0xff]   ;;  %v3737_v16 = vld [vmem:[#allocation9 + $0xc] ss:$16 sps:$4 sm:$0xff]  }
  0x5f   :  { %664 = vmatpush1.bf16.msra.mxu0 %v3738_v11  ;;  %v3744_v14 = vld [vmem:[#allocation9 + $0x20] ss:$16 sps:$4 sm:$0xff]   ;;  %v3745_v15 = vld [vmem:[#allocation9 + $0x44] ss:$16 sps:$4 sm:$0xff]   ;;  %v3735_v18 = vld [vmem:[#allocation9 + $0x8] ss:$16 sps:$4 sm:$0xff]  }
  0x60   :  { %186 = vmatpush1.bf16.msra.mxu1 %v3726_v4  ;;  %665 = vmatprep.subr.bf16.mxu0 %v3739_v12  ;;  %v3750_v17 = vld [vmem:[#allocation9 + $0x40] ss:$16 sps:$4 sm:$0xff]   ;;  %v3751_v19 = vld [vmem:[#allocation9 + $0x64] ss:$16 sps:$4 sm:$0xff]   ;;  %v3743_v20 = vld [vmem:[#allocation9 + $0x2c] ss:$16 sps:$4 sm:$0xff]  }
  0x61   :  { %224 = vmatprep.subr.bf16.mxu1 %v3729_v6  ;;  %v3741_v21 = vld [vmem:[#allocation9 + $0x28] ss:$16 sps:$4 sm:$0xff]   ;;  %v3756_v22 = vld [vmem:[#allocation9 + $0x60] ss:$16 sps:$4 sm:$0xff]   ;;  %v3757_v23 = vld [vmem:[#allocation9 + $0x84] ss:$16 sps:$4 sm:$0xff]  }
  0x62   :  { %v3749_v24 = vld [vmem:[#allocation9 + $0x4c] ss:$16 sps:$4 sm:$0xff]   ;;  %v3762_v25 = vld [vmem:[#allocation9 + $0x80] ss:$16 sps:$4 sm:$0xff]   ;;  %v3747_v26 = vld [vmem:[#allocation9 + $0x48] ss:$16 sps:$4 sm:$0xff]  }
  0x63   :  { %3352 = vmatmul.mubr.msk.bf16.vlgmr.msra.gmra.mrb[0].mxu1 %vm179_vm0, %v108_v7  ;;  %666 = vmatpush1.bf16.msra.mxu0 %v3744_v14  ;;  %v3763_v27 = vld [vmem:[#allocation9 + $0xa4] ss:$16 sps:$4 sm:$0xff]   ;;  %v3755_v28 = vld [vmem:[#allocation9 + $0x6c] ss:$16 sps:$4 sm:$0xff]   ;;  %v3753_v29 = vld [vmem:[#allocation9 + $0x68] ss:$16 sps:$4 sm:$0xff]  }
  0x64   :  { %225 = vmatpush1.bf16.msra.mxu1 %v3727_v9  ;;  %256 = vmatprep.mubr.bf16.mxu1 %v4348_v0  ;;  %v3768_v30 = vld [vmem:[#allocation9 + $0xa0] ss:$16 sps:$4 sm:$0xff]   ;;  %v3769_v31 = vld [vmem:[#allocation9 + $0xc4] ss:$16 sps:$4 sm:$0xff]   ;;  %v3761_v32 = vld [vmem:[#allocation9 + $0x8c] ss:$16 sps:$4 sm:$0xff]  }
  0x65   :  { %226 = vmatprep.subr.bf16.mxu1 %v3732_v10  ;;  %667 = vmatprep.subr.bf16.mxu0 %v3745_v15  ;;  %v3774_v33 = vld [vmem:[#allocation9 + $0xc0] ss:$16 sps:$4 sm:$0xff]   ;;  %v3759_v34 = vld [vmem:[#allocation9 + $0x88] ss:$16 sps:$4 sm:$0xff]   ;;  %v3775_v35 = vld [vmem:[#allocation9 + $0xe4] ss:$16 sps:$4 sm:$0xff]  }
  0x66   :  { %v3767_v36 = vld [vmem:[#allocation9 + $0xac] ss:$16 sps:$4 sm:$0xff]   ;;  %v3765_v37 = vld [vmem:[#allocation9 + $0xa8] ss:$16 sps:$4 sm:$0xff]   ;;  %v3780_v38 = vld [vmem:[#allocation9 + $0xe0] ss:$16 sps:$4 sm:$0xff]  }
  0x67   :  { %668 = vmatpush1.bf16.msra.mxu0 %v3750_v17  ;;  %v3781_v39 = vld [vmem:[#allocation9 + $0x104] ss:$16 sps:$4 sm:$0xff]   ;;  %v3773_v40 = vld [vmem:[#allocation9 + $0xcc] ss:$16 sps:$4 sm:$0xff]   ;;  %v3771_v41 = vld [vmem:[#allocation9 + $0xc8] ss:$16 sps:$4 sm:$0xff]  }
  0x68   :  { %227 = vmatpush1.bf16.msra.mxu1 %v3730_v13  ;;  %669 = vmatprep.subr.bf16.mxu0 %v3751_v19  ;;  %v3786_v42 = vld [vmem:[#allocation9 + $0x100] ss:$16 sps:$4 sm:$0xff]   ;;  %v3787_v43 = vld [vmem:[#allocation9 + $0x124] ss:$16 sps:$4 sm:$0xff]   ;;  %v3779_v44 = vld [vmem:[#allocation9 + $0xec] ss:$16 sps:$4 sm:$0xff]   ;;  %v119_v13 = vlaneseq }
  0x69   :  { %706 = vmatprep.subr.bf16.mxu1 %v3737_v16  ;;  %v3792_v45 = vld [vmem:[#allocation9 + $0x120] ss:$16 sps:$4 sm:$0xff]   ;;  %v3777_v46 = vld [vmem:[#allocation9 + $0xe8] ss:$16 sps:$4 sm:$0xff]   ;;  %v3793_v47 = vld [vmem:[#allocation9 + $0x144] ss:$16 sps:$4 sm:$0xff]  }
  0x6a   :  { %v3785_v48 = vld [vmem:[#allocation9 + $0x10c] ss:$16 sps:$4 sm:$0xff]   ;;  %v3798_v49 = vld [vmem:[#allocation9 + $0x140] ss:$16 sps:$4 sm:$0xff]   ;;  %v3783_v50 = vld [vmem:[#allocation9 + $0x108] ss:$16 sps:$4 sm:$0xff]  }
  0x6b   :  { %3353 = vmatmul.mubr.msk.bf16.vlgmr.msra.gmra.mrb[4].mxu1 %vm179_vm0, %v108_v7  ;;  %670 = vmatpush1.bf16.msra.mxu0 %v3756_v22  ;;  %v3799_v51 = vld [vmem:[#allocation9 + $0x164] ss:$16 sps:$4 sm:$0xff]   ;;  %v3791_v52 = vld [vmem:[#allocation9 + $0x12c] ss:$16 sps:$4 sm:$0xff]   ;;  %v3804_v53 = vld [vmem:[#allocation9 + $0x160] ss:$16 sps:$4 sm:$0xff]  }
  0x6c   :  { %707 = vmatpush1.bf16.msra.mxu1 %v3735_v18  ;;  %671 = vmatprep.subr.bf16.mxu0 %v3757_v23  ;;  %v3789_v54 = vld [vmem:[#allocation9 + $0x128] ss:$16 sps:$4 sm:$0xff]   ;;  %v3797_v55 = vld [vmem:[#allocation9 + $0x14c] ss:$16 sps:$4 sm:$0xff]   ;;  %v3805_v59 = vld [vmem:[#allocation9 + $0x184] ss:$16 sps:$4 sm:$0xff]  }
  0x6d   :  { %708 = vmatprep.subr.bf16.mxu1 %v3743_v20  ;;  %v3795_v56 = vld [vmem:[#allocation9 + $0x148] ss:$16 sps:$4 sm:$0xff]   ;;  %v3803_v57 = vld [vmem:[#allocation9 + $0x16c] ss:$16 sps:$4 sm:$0xff]   ;;  %v3810_v62 = vld [vmem:[#allocation9 + $0x180] ss:$16 sps:$4 sm:$0xff]  }
  0x6e   :  { %v3801_v58 = vld [vmem:[#allocation9 + $0x168] ss:$16 sps:$4 sm:$0xff]   ;;  %v3809_v60 = vld [vmem:[#allocation9 + $0x18c] ss:$16 sps:$4 sm:$0xff]   ;;  %v3811_v63 = vld [vmem:[#allocation9 + $0x1a4] ss:$16 sps:$4 sm:$0xff]  }
  0x6f   :  { %672 = vmatpush1.bf16.msra.mxu0 %v3762_v25  ;;  %v3807_v61 = vld [vmem:[#allocation9 + $0x188] ss:$16 sps:$4 sm:$0xff]   ;;  %v3815_v0 = vld [vmem:[#allocation9 + $0x1ac] ss:$16 sps:$4 sm:$0xff]   ;;  %v3816_v2 = vld [vmem:[#allocation9 + $0x1a0] ss:$16 sps:$4 sm:$0xff]  }
  0x70   :  { %709 = vmatpush1.bf16.msra.mxu1 %v3741_v21  ;;  %673 = vmatprep.subr.bf16.mxu0 %v3763_v27  ;;  %v3813_v1 = vld [vmem:[#allocation9 + $0x1a8] ss:$16 sps:$4 sm:$0xff]   ;;  %v3817_v3 = vld [vmem:[#allocation9 + $0x1c4] ss:$16 sps:$4 sm:$0xff]   ;;  %v3821_v4 = vld [vmem:[#allocation9 + $0x1cc] ss:$16 sps:$4 sm:$0xff]  }
  0x71   :  { %710 = vmatprep.subr.bf16.mxu1 %v3749_v24  ;;  %v3819_v5 = vld [vmem:[#allocation9 + $0x1c8] ss:$16 sps:$4 sm:$0xff]   ;;  %v3822_v6 = vld [vmem:[#allocation9 + $0x1c0] ss:$16 sps:$4 sm:$0xff]   ;;  %v3823_v7 = vld [vmem:[#allocation9 + $0x1e4] ss:$16 sps:$4 sm:$0xff]  }
  0x72   :  { %v3827_v8 = vld [vmem:[#allocation9 + $0x1ec] ss:$16 sps:$4 sm:$0xff]   ;;  %v3825_v9 = vld [vmem:[#allocation9 + $0x1e8] ss:$16 sps:$4 sm:$0xff]   ;;  %v3828_v10 = vld [vmem:[#allocation9 + $0x1e0] ss:$16 sps:$4 sm:$0xff]  }
  0x73   :  { %674 = vmatpush1.bf16.msra.mxu0 %v3768_v30  ;;  %v3831_v11 = vld [vmem:[#allocation11 + $0x4] ss:$24 sps:$4 sm:$0xff]   ;;  %v120_v14 = vshrl.u32 %v119_v13, 7  ;;  %v117_v16 = vld [vmem:[%s4649_s2] sm:$0xf] }
  0x74   :  { %711 = vmatpush1.bf16.msra.mxu1 %v3747_v26  ;;  %675 = vmatprep.subr.bf16.mxu0 %v3769_v31  ;;  %v3834_v12 = vld [vmem:[#allocation11 + $0xc] ss:$24 sps:$4 sm:$0xff]   ;;  %v3888_v13 = vld [vmem:[#allocation11 + $0x1bc] ss:$24 sps:$4 sm:$0xff]  }
  0x75   :  { %712 = vmatprep.subr.bf16.mxu1 %v3755_v28  ;;  %v4486_v15 = vsub.s32 0, %v120_v14  ;;  %v4491_v18 = vsub.s32 1, %v120_v14  ;;  %v129_v20 = vsub.s32 2, %v120_v14  ;;  %v133_v22 = vsub.s32 3, %v120_v14  ;;  %v3883_v14 = vld [vmem:[#allocation11 + $0x1b0] ss:$24 sps:$4 sm:$0xff]  }
  0x77   :  { %676 = vmatpush1.bf16.msra.mxu0 %v3774_v33  ;;  %v122_v23 = vrot.slane %v117_v16, %v4486_v15  ;;  %v126_v25 = vrot.slane %v117_v16, %v4491_v18  ;;  %v130_v26 = vrot.slane %v117_v16, %v129_v20  ;;  %v134_v27 = vrot.slane %v117_v16, %v133_v22  ;;  %v3886_v16 = vld [vmem:[#allocation11 + $0x1b8] ss:$24 sps:$4 sm:$0xff]   ;;  %v3897_v22 = vld [vmem:[#allocation11 + $0x214] ss:$24 sps:$4 sm:$0xff]  }
  0x78   :  { %713 = vmatpush1.bf16.msra.mxu1 %v3753_v29  ;;  %677 = vmatprep.subr.bf16.mxu0 %v3775_v35  ;;  %v3889_v20 = vld [vmem:[#allocation11 + $0x1e0] ss:$24 sps:$4 sm:$0xff]  }
  0x79   :  { %714 = vmatprep.subr.bf16.mxu1 %v3761_v32 }
  0x7b   :  { %678 = vmatpush1.bf16.msra.mxu0 %v3780_v38 }
  0x7c   :  { %715 = vmatpush1.bf16.msra.mxu1 %v3759_v34  ;;  %679 = vmatprep.subr.bf16.mxu0 %v3781_v39 }
  0x7d   :  { %716 = vmatprep.subr.bf16.mxu1 %v3767_v36 }
  0x7f   :  { %680 = vmatpush1.bf16.msra.mxu0 %v3786_v42  ;;  %v3829_v42 = vld [vmem:[#allocation11] ss:$24 sps:$4 sm:$0xff]  }
  0x80   :  { %717 = vmatpush1.bf16.msra.mxu1 %v3765_v37  ;;  %681 = vmatprep.subr.bf16.mxu0 %v3787_v43  ;;  %v3832_v43 = vld [vmem:[#allocation11 + $0x8] ss:$24 sps:$4 sm:$0xff]  }
  0x81   :  { %718 = vmatprep.subr.bf16.mxu1 %v3773_v40 }
  0x83   :  { %682 = vmatpush1.bf16.msra.mxu0 %v3792_v45  ;;  %v3840_v45 = vld [vmem:[#allocation11 + $0x3c] ss:$24 sps:$4 sm:$0xff]  }
  0x84   :  { %719 = vmatpush1.bf16.msra.mxu1 %v3771_v41  ;;  %683 = vmatprep.subr.bf16.mxu0 %v3793_v47  ;;  %v3838_v47 = vld [vmem:[#allocation11 + $0x38] ss:$24 sps:$4 sm:$0xff]  }
  0x85   :  { %720 = vmatprep.subr.bf16.mxu1 %v3779_v44  ;;  %v3837_v44 = vld [vmem:[#allocation11 + $0x34] ss:$24 sps:$4 sm:$0xff]  }
  0x87   :  { %684 = vmatpush1.bf16.msra.mxu0 %v3798_v49  ;;  %v3846_v49 = vld [vmem:[#allocation11 + $0x6c] ss:$24 sps:$4 sm:$0xff]  }
  0x88   :  { %721 = vmatpush1.bf16.msra.mxu1 %v3777_v46  ;;  %685 = vmatprep.subr.bf16.mxu0 %v3799_v51  ;;  %v3835_v46 = vld [vmem:[#allocation11 + $0x30] ss:$24 sps:$4 sm:$0xff]  }
  0x89   :  { %722 = vmatprep.subr.bf16.mxu1 %v3785_v48  ;;  %v3843_v48 = vld [vmem:[#allocation11 + $0x64] ss:$24 sps:$4 sm:$0xff]   ;;  %v3844_v51 = vld [vmem:[#allocation11 + $0x68] ss:$24 sps:$4 sm:$0xff]  }
  0x8b   :  { %686 = vmatpush1.bf16.msra.mxu0 %v3804_v53  ;;  %v3852_v53 = vld [vmem:[#allocation11 + $0x9c] ss:$24 sps:$4 sm:$0xff]  }
  0x8c   :  { %723 = vmatpush1.bf16.msra.mxu1 %v3783_v50  ;;  %687 = vmatprep.subr.bf16.mxu0 %v3805_v59  ;;  %v3841_v50 = vld [vmem:[#allocation11 + $0x60] ss:$24 sps:$4 sm:$0xff]  }
  0x8d   :  { %724 = vmatprep.subr.bf16.mxu1 %v3791_v52  ;;  %v3849_v52 = vld [vmem:[#allocation11 + $0x94] ss:$24 sps:$4 sm:$0xff]   ;;  %v3856_v59 = vld [vmem:[#allocation11 + $0xc8] ss:$24 sps:$4 sm:$0xff]  }
  0x8f   :  { %688 = vmatpush1.bf16.msra.mxu0 %v3810_v62  ;;  %v3859_v62 = vld [vmem:[#allocation11 + $0xf0] ss:$24 sps:$4 sm:$0xff]  }
  0x90   :  { %725 = vmatpush1.bf16.msra.mxu1 %v3789_v54  ;;  %689 = vmatprep.subr.bf16.mxu0 %v3811_v63  ;;  %v3847_v54 = vld [vmem:[#allocation11 + $0x90] ss:$24 sps:$4 sm:$0xff]  }
  0x91   :  { %726 = vmatprep.subr.bf16.mxu1 %v3797_v55  ;;  %v3850_v55 = vld [vmem:[#allocation11 + $0x98] ss:$24 sps:$4 sm:$0xff]  }
  0x92   :  { %v3862_v63 = vld [vmem:[#allocation11 + $0xf8] ss:$24 sps:$4 sm:$0xff]  }
  0x93   :  { %690 = vmatpush1.bf16.msra.mxu0 %v3816_v2  ;;  %v3865_v2 = vld [vmem:[#allocation11 + $0x120] ss:$24 sps:$4 sm:$0xff]  }
  0x94   :  { %727 = vmatpush1.bf16.msra.mxu1 %v3795_v56  ;;  %691 = vmatprep.subr.bf16.mxu0 %v3817_v3  ;;  %v3855_v56 = vld [vmem:[#allocation11 + $0xc4] ss:$24 sps:$4 sm:$0xff]   ;;  %v3868_v3 = vld [vmem:[#allocation11 + $0x128] ss:$24 sps:$4 sm:$0xff]  }
  0x95   :  { %728 = vmatprep.subr.bf16.mxu1 %v3803_v57  ;;  %v3858_v57 = vld [vmem:[#allocation11 + $0xcc] ss:$24 sps:$4 sm:$0xff]  }
  0x97   :  { %692 = vmatpush1.bf16.msra.mxu0 %v3822_v6  ;;  %v3871_v6 = vld [vmem:[#allocation11 + $0x150] ss:$24 sps:$4 sm:$0xff]  }
  0x98   :  { %729 = vmatpush1.bf16.msra.mxu1 %v3801_v58  ;;  %693 = vmatprep.subr.bf16.mxu0 %v3823_v7  ;;  %v3853_v58 = vld [vmem:[#allocation11 + $0xc0] ss:$24 sps:$4 sm:$0xff]  }
  0x99   :  { %730 = vmatprep.subr.bf16.mxu1 %v3809_v60  ;;  %v3861_v60 = vld [vmem:[#allocation11 + $0xf4] ss:$24 sps:$4 sm:$0xff]   ;;  %v3874_v7 = vld [vmem:[#allocation11 + $0x158] ss:$24 sps:$4 sm:$0xff]  }
  0x9b   :  { %694 = vmatpush1.bf16.msra.mxu0 %v3828_v10  ;;  %v3877_v10 = vld [vmem:[#allocation11 + $0x180] ss:$24 sps:$4 sm:$0xff]  }
  0x9c   :  { %731 = vmatpush1.bf16.msra.mxu1 %v3807_v61  ;;  %1389 = vmatprep.subr.bf16.mxu0 %v3831_v11  ;;  %v3864_v61 = vld [vmem:[#allocation11 + $0xfc] ss:$24 sps:$4 sm:$0xff]   ;;  %v3880_v11 = vld [vmem:[#allocation11 + $0x188] ss:$24 sps:$4 sm:$0xff]  }
  0x9d   :  { %732 = vmatprep.subr.bf16.mxu1 %v3815_v0  ;;  %v3867_v0 = vld [vmem:[#allocation11 + $0x124] ss:$24 sps:$4 sm:$0xff]  }
  0xa0   :  { %733 = vmatpush1.bf16.msra.mxu1 %v3813_v1  ;;  %v3870_v1 = vld [vmem:[#allocation11 + $0x12c] ss:$24 sps:$4 sm:$0xff]  }
  0xa1   :  { %734 = vmatprep.subr.bf16.mxu1 %v3821_v4  ;;  %v3873_v4 = vld [vmem:[#allocation11 + $0x154] ss:$24 sps:$4 sm:$0xff]  }
  0xa4   :  { %735 = vmatpush1.bf16.msra.mxu1 %v3819_v5  ;;  %v3876_v5 = vld [vmem:[#allocation11 + $0x15c] ss:$24 sps:$4 sm:$0xff]  }
  0xa5   :  { %736 = vmatprep.subr.bf16.mxu1 %v3827_v8  ;;  %v3879_v8 = vld [vmem:[#allocation11 + $0x184] ss:$24 sps:$4 sm:$0xff]  }
  0xa8   :  { %737 = vmatpush1.bf16.msra.mxu1 %v3825_v9  ;;  %v3882_v9 = vld [vmem:[#allocation11 + $0x18c] ss:$24 sps:$4 sm:$0xff]  }
  0xa9   :  { %1442 = vmatprep.subr.bf16.mxu1 %v3834_v12  ;;  %v3885_v12 = vld [vmem:[#allocation11 + $0x1b4] ss:$24 sps:$4 sm:$0xff]  }
 0x136   :  { %v217_v17 = vpop.f32.mrb[0].mxu1 }
 0x137   :  { %v219_v19 = vpop.f32.mrb[1].mxu1  ;;  %v218_v28 = vadd.f32 %v217_v17, %v122_v23  ;;  %v3891_v17 = vld [vmem:[#allocation11 + $0x1e4] ss:$24 sps:$4 sm:$0xff]  }
 0x138   :  { %v221_v21 = vpop.f32.mrb[2].mxu1  ;;  %v220_v29 = vadd.f32 %v219_v19, %v126_v25  ;;  %v3894_v19 = vld [vmem:[#allocation11 + $0x1ec] ss:$24 sps:$4 sm:$0xff]   ;;  %v3900_v23 = vld [vmem:[#allocation11 + $0x21c] ss:$24 sps:$4 sm:$0xff]  }
 0x139   :  { %v222_v24 = vpop.f32.mrb[3].mxu1  ;;  %v265_v35 = vmax.f32 %v218_v28, 0.0  ;;  %v3892_v21 = vld [vmem:[#allocation11 + $0x1e8] ss:$24 sps:$4 sm:$0xff]   ;;  %v3898_v25 = vld [vmem:[#allocation11 + $0x218] ss:$24 sps:$4 sm:$0xff]  }
 0x13a   :  { %v266_v38 = vmax.f32 %v220_v29, 0.0  ;;  %v3895_v24 = vld [vmem:[#allocation11 + $0x210] ss:$24 sps:$4 sm:$0xff]   ;;  %v3901_v28 = vld [vmem:[#allocation11 + $0x240] ss:$24 sps:$4 sm:$0xff]  }
 0x13b   :  { %v3904_v29 = vld [vmem:[#allocation11 + $0x248] ss:$24 sps:$4 sm:$0xff]  }
 0x13e   :  { %v258_v30 = vpop.f32.mrb[4].mxu1 }
 0x13f   :  { %v259_v31 = vadd.f32 %v258_v30, %v130_v26  ;;  %v260_v32 = vpop.f32.mrb[5].mxu1  ;;  %v3903_v26 = vld [vmem:[#allocation11 + $0x244] ss:$24 sps:$4 sm:$0xff]   ;;  %v3909_v30 = vld [vmem:[#allocation11 + $0x274] ss:$24 sps:$4 sm:$0xff]  }
 0x140   :  { %v261_v33 = vadd.f32 %v260_v32, %v134_v27  ;;  %v262_v34 = vpop.f32.mrb[6].mxu1  ;;  %v3906_v27 = vld [vmem:[#allocation11 + $0x24c] ss:$24 sps:$4 sm:$0xff]   ;;  %v3907_v32 = vld [vmem:[#allocation11 + $0x270] ss:$24 sps:$4 sm:$0xff]  }
 0x141   :  { %v267_v36 = vmax.f32 %v259_v31, 0.0  ;;  %v263_v37 = vpop.f32.mrb[7].mxu1  ;;  %v3912_v31 = vld [vmem:[#allocation11 + $0x27c] ss:$24 sps:$4 sm:$0xff]  }
 0x142   :  { %v268_v39 = vmax.f32 %v261_v33, 0.0  ;;  %v3910_v33 = vld [vmem:[#allocation11 + $0x278] ss:$24 sps:$4 sm:$0xff]   ;;  %v3915_v34 = vld [vmem:[#allocation11 + $0x2a4] ss:$24 sps:$4 sm:$0xff]  }
 0x143   :  { %v277_v40 = vpack.c.bf16 %v267_v36, %v265_v35  ;;  %v3913_v35 = vld [vmem:[#allocation11 + $0x2a0] ss:$24 sps:$4 sm:$0xff]   ;;  %v3918_v36 = vld [vmem:[#allocation11 + $0x2ac] ss:$24 sps:$4 sm:$0xff]  }
 0x144   :  { %v278_v41 = vpack.c.bf16 %v268_v39, %v266_v38  ;;  %v3916_v37 = vld [vmem:[#allocation11 + $0x2a8] ss:$24 sps:$4 sm:$0xff]   ;;  %v3921_v38 = vld [vmem:[#allocation11 + $0x2d4] ss:$24 sps:$4 sm:$0xff]  }
 0x145   :  { %v3919_v39 = vld [vmem:[#allocation11 + $0x2d0] ss:$24 sps:$4 sm:$0xff]  }
 0x146   :  { %695 = vmatprep.mubr.bf16.mxu0 %v278_v41  ;;  %738 = vmatprep.mubr.bf16.mxu1 %v278_v41  ;;  %v3922_v41 = vld [vmem:[#allocation11 + $0x2d8] ss:$24 sps:$4 sm:$0xff]  }
 0x147   :  { %696 = vmatmul.mubr.bf16.vlgmr.msra.gmra.mrb[0].mxu0 %v277_v40  ;;  %739 = vmatmul.mubr.bf16.vlgmr.msra.gmra.mrb[8].mxu1 %v277_v40  ;;  %v3924_v40 = vld [vmem:[#allocation11 + $0x2dc] ss:$24 sps:$4 sm:$0xff]  }
 0x148   :  { %1390 = vmatpush1.bf16.msra.mxu0 %v3829_v42  ;;  %1443 = vmatpush1.bf16.msra.mxu1 %v3832_v43  ;;  %v3927_v42 = vld [vmem:[#allocation11 + $0x14] ss:$24 sps:$4 sm:$0xff]   ;;  %v3975_v43 = vld [vmem:[#allocation12 + $0x4] ss:$24 sps:$4 sm:$0xff]  }
 0x149   :  { %1391 = vmatprep.subr.bf16.mxu0 %v3837_v44  ;;  %1444 = vmatprep.subr.bf16.mxu1 %v3840_v45  ;;  %v765_v44 = vld [vmem:[%s4651_s4] sm:$0x3] }
 0x14a   :  { %v770_v45 = vrot.slane %v765_v44, %v4486_v15 }
 0x14c   :  { %1392 = vmatpush1.bf16.msra.mxu0 %v3835_v46  ;;  %1445 = vmatpush1.bf16.msra.mxu1 %v3838_v47  ;;  %v774_v46 = vrot.slane %v765_v44, %v4491_v18  ;;  %v4011_v44 = vld [vmem:[#allocation12 + $0x124] ss:$24 sps:$4 sm:$0xff]  }
 0x14d   :  { %1393 = vmatprep.subr.bf16.mxu0 %v3843_v48  ;;  %1446 = vmatprep.subr.bf16.mxu1 %v3846_v49 }
 0x150   :  { %1394 = vmatpush1.bf16.msra.mxu0 %v3841_v50  ;;  %1447 = vmatpush1.bf16.msra.mxu1 %v3844_v51 }
 0x151   :  { %1395 = vmatprep.subr.bf16.mxu0 %v3849_v52  ;;  %1448 = vmatprep.subr.bf16.mxu1 %v3852_v53 }
 0x154   :  { %1396 = vmatpush1.bf16.msra.mxu0 %v3847_v54  ;;  %1449 = vmatpush1.bf16.msra.mxu1 %v3850_v55 }
 0x155   :  { %1397 = vmatprep.subr.bf16.mxu0 %v3855_v56  ;;  %1450 = vmatprep.subr.bf16.mxu1 %v3858_v57 }
 0x158   :  { %1398 = vmatpush1.bf16.msra.mxu0 %v3853_v58  ;;  %1451 = vmatpush1.bf16.msra.mxu1 %v3856_v59 }
 0x159   :  { %1399 = vmatprep.subr.bf16.mxu0 %v3861_v60  ;;  %1452 = vmatprep.subr.bf16.mxu1 %v3864_v61 }
 0x15c   :  { %1400 = vmatpush1.bf16.msra.mxu0 %v3859_v62  ;;  %1453 = vmatpush1.bf16.msra.mxu1 %v3862_v63 }
 0x15d   :  { %1401 = vmatprep.subr.bf16.mxu0 %v3867_v0  ;;  %1454 = vmatprep.subr.bf16.mxu1 %v3870_v1 }
 0x160   :  { %1402 = vmatpush1.bf16.msra.mxu0 %v3865_v2  ;;  %1455 = vmatpush1.bf16.msra.mxu1 %v3868_v3 }
 0x161   :  { %1403 = vmatprep.subr.bf16.mxu0 %v3873_v4  ;;  %1456 = vmatprep.subr.bf16.mxu1 %v3876_v5 }
 0x164   :  { %1404 = vmatpush1.bf16.msra.mxu0 %v3871_v6  ;;  %1457 = vmatpush1.bf16.msra.mxu1 %v3874_v7 }
 0x165   :  { %1405 = vmatprep.subr.bf16.mxu0 %v3879_v8  ;;  %1458 = vmatprep.subr.bf16.mxu1 %v3882_v9 }
 0x168   :  { %1406 = vmatpush1.bf16.msra.mxu0 %v3877_v10  ;;  %1459 = vmatpush1.bf16.msra.mxu1 %v3880_v11 }
 0x169   :  { %1407 = vmatprep.subr.bf16.mxu0 %v3885_v12  ;;  %1460 = vmatprep.subr.bf16.mxu1 %v3888_v13 }
 0x16c   :  { %1408 = vmatpush1.bf16.msra.mxu0 %v3883_v14  ;;  %1461 = vmatpush1.bf16.msra.mxu1 %v3886_v16  ;;  %v3925_v16 = vld [vmem:[#allocation11 + $0x10] ss:$24 sps:$4 sm:$0xff]  }
 0x16d   :  { %1409 = vmatprep.subr.bf16.mxu0 %v3891_v17  ;;  %1462 = vmatprep.subr.bf16.mxu1 %v3894_v19 }
 0x170   :  { %1410 = vmatpush1.bf16.msra.mxu0 %v3889_v20  ;;  %1463 = vmatpush1.bf16.msra.mxu1 %v3892_v21 }
 0x171   :  { %1411 = vmatprep.subr.bf16.mxu0 %v3897_v22  ;;  %1464 = vmatprep.subr.bf16.mxu1 %v3900_v23  ;;  %v3930_v22 = vld [vmem:[#allocation11 + $0x44] ss:$24 sps:$4 sm:$0xff]   ;;  %v3973_v23 = vld [vmem:[#allocation12] ss:$24 sps:$4 sm:$0xff]  }
 0x174   :  { %1412 = vmatpush1.bf16.msra.mxu0 %v3895_v24  ;;  %1465 = vmatpush1.bf16.msra.mxu1 %v3898_v25  ;;  %v3981_v24 = vld [vmem:[#allocation12 + $0x34] ss:$24 sps:$4 sm:$0xff]   ;;  %v3928_v25 = vld [vmem:[#allocation11 + $0x40] ss:$24 sps:$4 sm:$0xff]  }
 0x175   :  { %1413 = vmatprep.subr.bf16.mxu0 %v3903_v26  ;;  %1466 = vmatprep.subr.bf16.mxu1 %v3906_v27  ;;  %v3933_v26 = vld [vmem:[#allocation11 + $0x74] ss:$24 sps:$4 sm:$0xff]   ;;  %v3979_v27 = vld [vmem:[#allocation12 + $0x30] ss:$24 sps:$4 sm:$0xff]  }
 0x178   :  { %1414 = vmatpush1.bf16.msra.mxu0 %v3901_v28  ;;  %1467 = vmatpush1.bf16.msra.mxu1 %v3904_v29  ;;  %v3931_v28 = vld [vmem:[#allocation11 + $0x70] ss:$24 sps:$4 sm:$0xff]   ;;  %v3936_v29 = vld [vmem:[#allocation11 + $0xa4] ss:$24 sps:$4 sm:$0xff]  }
 0x179   :  { %1415 = vmatprep.subr.bf16.mxu0 %v3909_v30  ;;  %1468 = vmatprep.subr.bf16.mxu1 %v3912_v31  ;;  %v3987_v30 = vld [vmem:[#allocation12 + $0x64] ss:$24 sps:$4 sm:$0xff]   ;;  %v3985_v31 = vld [vmem:[#allocation12 + $0x60] ss:$24 sps:$4 sm:$0xff]  }
 0x17c   :  { %1416 = vmatpush1.bf16.msra.mxu0 %v3907_v32  ;;  %1469 = vmatpush1.bf16.msra.mxu1 %v3910_v33  ;;  %v3993_v32 = vld [vmem:[#allocation12 + $0x94] ss:$24 sps:$4 sm:$0xff]   ;;  %v3934_v33 = vld [vmem:[#allocation11 + $0xa0] ss:$24 sps:$4 sm:$0xff]  }
 0x17d   :  { %1417 = vmatprep.subr.bf16.mxu0 %v3915_v34  ;;  %1470 = vmatprep.subr.bf16.mxu1 %v3918_v36  ;;  %v3939_v34 = vld [vmem:[#allocation11 + $0xd4] ss:$24 sps:$4 sm:$0xff]   ;;  %v3999_v36 = vld [vmem:[#allocation12 + $0xc4] ss:$24 sps:$4 sm:$0xff]  }
 0x180   :  { %1418 = vmatpush1.bf16.msra.mxu0 %v3913_v35  ;;  %1471 = vmatpush1.bf16.msra.mxu1 %v3916_v37  ;;  %v3991_v35 = vld [vmem:[#allocation12 + $0x90] ss:$24 sps:$4 sm:$0xff]  }
 0x181   :  { %1419 = vmatprep.subr.bf16.mxu0 %v3921_v38  ;;  %1472 = vmatprep.subr.bf16.mxu1 %v3924_v40  ;;  %v3937_v37 = vld [vmem:[#allocation11 + $0xd0] ss:$24 sps:$4 sm:$0xff]   ;;  %v3942_v38 = vld [vmem:[#allocation11 + $0x104] ss:$24 sps:$4 sm:$0xff]   ;;  %v4005_v40 = vld [vmem:[#allocation12 + $0xf4] ss:$24 sps:$4 sm:$0xff]  }
 0x184   :  { %1420 = vmatpush1.bf16.msra.mxu0 %v3919_v39  ;;  %1473 = vmatpush1.bf16.msra.mxu1 %v3922_v41  ;;  %v3997_v39 = vld [vmem:[#allocation12 + $0xc0] ss:$24 sps:$4 sm:$0xff]  }
 0x185   :  { %1495 = vmatprep.subr.bf16.mxu0 %v3927_v42  ;;  %2286 = vmatprep.subr.bf16.mxu1 %v3975_v43  ;;  %v3940_v41 = vld [vmem:[#allocation11 + $0x100] ss:$24 sps:$4 sm:$0xff]   ;;  %v3945_v42 = vld [vmem:[#allocation11 + $0x134] ss:$24 sps:$4 sm:$0xff]   ;;  %v4003_v43 = vld [vmem:[#allocation12 + $0xf0] ss:$24 sps:$4 sm:$0xff]  }
 0x21a   :  { %v697_v47 = vpop.f32.mrb[0].mxu0  ;;  %v740_v48 = vpop.f32.mrb[8].mxu1 }
 0x21b   :  { %v777_v49 = vadd.f32 %v770_v45, %v697_v47  ;;  %v779_v50 = vadd.f32 %v770_v45, %v740_v48  ;;  %v699_v51 = vpop.f32.mrb[1].mxu0  ;;  %v742_v52 = vpop.f32.mrb[9].mxu1  ;;  %v4009_v47 = vld [vmem:[#allocation12 + $0x120] ss:$24 sps:$4 sm:$0xff]   ;;  %v4017_v48 = vld [vmem:[#allocation12 + $0x154] ss:$24 sps:$4 sm:$0xff]  }
 0x21c   :  { %v778_v53 = vadd.f32 %v774_v46, %v699_v51  ;;  %v780_v54 = vadd.f32 %v774_v46, %v742_v52  ;;  %v701_v55 = vpop.f32.mrb[2].mxu0  ;;  %v744_v56 = vpop.f32.mrb[10].mxu1  ;;  %v4015_v51 = vld [vmem:[#allocation12 + $0x150] ss:$24 sps:$4 sm:$0xff]   ;;  %v4023_v52 = vld [vmem:[#allocation12 + $0x184] ss:$24 sps:$4 sm:$0xff]  }
 0x21d   :  { %vm785_vm1 = vcmp.ge.f32.partialorder %v777_v49, 0.0  ;;  %v793_v57 = vmul.f32 0.01, %v777_v49  ;;  %vm787_vm2 = vcmp.ge.f32.partialorder %v779_v50, 0.0  ;;  %v795_v58 = vmul.f32 0.01, %v779_v50 }
 0x21e   :  { %vm786_vm3 = vcmp.ge.f32.partialorder %v778_v53, 0.0  ;;  %v794_v59 = vmul.f32 0.01, %v778_v53  ;;  %vm788_vm4 = vcmp.ge.f32.partialorder %v780_v54, 0.0  ;;  %v796_v60 = vmul.f32 0.01, %v780_v54 }
 0x21f   :  { %v801_v61 = vsel %vm785_vm1, %v777_v49, %v793_v57  ;;  %v803_v62 = vsel %vm787_vm2, %v779_v50, %v795_v58  ;;  %v781_v63 = vadd.f32 %v770_v45, %v701_v55  ;;  %v783_v0 = vadd.f32 %v770_v45, %v744_v56  ;;  %v703_v1 = vpop.f32.mrb[3].mxu0  ;;  %v746_v2 = vpop.f32.mrb[11].mxu1  ;;  %v3943_v45 = vld [vmem:[#allocation11 + $0x130] ss:$24 sps:$4 sm:$0xff]   ;;  %v3946_v49 = vld [vmem:[#allocation11 + $0x160] ss:$24 sps:$4 sm:$0xff]  }
 0x220   :  { %v4500_v3 = vpack.c.bf16 %v803_v62, %v801_v61  ;;  %v782_v4 = vadd.f32 %v774_v46, %v703_v1  ;;  %v784_v5 = vadd.f32 %v774_v46, %v746_v2  ;;  %v802_v6 = vsel %vm786_vm3, %v778_v53, %v794_v59  ;;  %v3948_v46 = vld [vmem:[#allocation11 + $0x164] ss:$24 sps:$4 sm:$0xff]   ;;  %v3951_v50 = vld [vmem:[#allocation11 + $0x194] ss:$24 sps:$4 sm:$0xff]   ;;  %v3949_v53 = vld [vmem:[#allocation11 + $0x190] ss:$24 sps:$4 sm:$0xff]  }
 0x221   :  { %vm789_vm5 = vcmp.ge.f32.partialorder %v781_v63, 0.0  ;;  %v797_v7 = vmul.f32 0.01, %v781_v63  ;;  %vm791_vm6 = vcmp.ge.f32.partialorder %v783_v0, 0.0  ;;  %v799_v8 = vmul.f32 0.01, %v783_v0 }
 0x222   :  { %vm790_vm7 = vcmp.ge.f32.partialorder %v782_v4, 0.0  ;;  %v798_v9 = vmul.f32 0.01, %v782_v4  ;;  %vm792_vm8 = vcmp.ge.f32.partialorder %v784_v5, 0.0  ;;  %v800_v10 = vmul.f32 0.01, %v784_v5 }
 0x223   :  { %v804_v11 = vsel %vm788_vm4, %v780_v54, %v796_v60  ;;  %v805_v12 = vsel %vm789_vm5, %v781_v63, %v797_v7  ;;  %v807_v13 = vsel %vm791_vm6, %v783_v0, %v799_v8  ;;  %v3954_v54 = vld [vmem:[#allocation11 + $0x1c4] ss:$24 sps:$4 sm:$0xff]   ;;  %v4021_v55 = vld [vmem:[#allocation12 + $0x180] ss:$24 sps:$4 sm:$0xff]   ;;  %v4029_v56 = vld [vmem:[#allocation12 + $0x1b4] ss:$24 sps:$4 sm:$0xff]  }
 0x224   :  { %v810_v14 = vpack.c.bf16 %v804_v11, %v802_v6  ;;  %v806_v17 = vsel %vm790_vm7, %v782_v4, %v798_v9  ;;  %v808_v19 = vsel %vm792_vm8, %v784_v5, %v800_v10  ;;  %v4503_v20 = vpack.c.bf16 %v807_v13, %v805_v12  ;;  %v3952_v57 = vld [vmem:[#allocation11 + $0x1c0] ss:$24 sps:$4 sm:$0xff]   ;;  %v3957_v58 = vld [vmem:[#allocation11 + $0x1f4] ss:$24 sps:$4 sm:$0xff]   ;;  %v4027_v59 = vld [vmem:[#allocation12 + $0x1b0] ss:$24 sps:$4 sm:$0xff]  }
 0x225   :  { %v4505_v21 = vpack.c.bf16 %v808_v19, %v806_v17  ;;  %v4035_v60 = vld [vmem:[#allocation12 + $0x1e4] ss:$24 sps:$4 sm:$0xff]   ;;  %v3955_v61 = vld [vmem:[#allocation11 + $0x1f0] ss:$24 sps:$4 sm:$0xff]   ;;  %v4033_v63 = vld [vmem:[#allocation12 + $0x1e0] ss:$24 sps:$4 sm:$0xff]  }
 0x226   :  { %1421 = vmatprep.mubr.bf16.mxu0 %v810_v14  ;;  %1474 = vmatprep.mubr.bf16.mxu1 %v810_v14  ;;  %v3960_v62 = vld [vmem:[#allocation11 + $0x224] ss:$24 sps:$4 sm:$0xff]   ;;  %v4041_v0 = vld [vmem:[#allocation12 + $0x214] ss:$24 sps:$4 sm:$0xff]   ;;  %v3958_v1 = vld [vmem:[#allocation11 + $0x220] ss:$24 sps:$4 sm:$0xff]  }
 0x227   :  { %1422 = vmatmul.mubr.bf16.vlgmr.msra.gmra.mrb[4].mxu0 %v4500_v3  ;;  %1475 = vmatmul.mubr.bf16.vlgmr.msra.gmra.mrb[12].mxu1 %v4500_v3  ;;  %v3963_v2 = vld [vmem:[#allocation11 + $0x254] ss:$24 sps:$4 sm:$0xff]   ;;  %v4039_v4 = vld [vmem:[#allocation12 + $0x210] ss:$24 sps:$4 sm:$0xff]   ;;  %v4047_v5 = vld [vmem:[#allocation12 + $0x244] ss:$24 sps:$4 sm:$0xff]  }
 0x228   :  { %1496 = vmatpush1.bf16.msra.mxu0 %v3925_v16  ;;  %1431 = vmatprep.mubr.bf16.mxu0 %v4505_v21  ;;  %v3961_v6 = vld [vmem:[#allocation11 + $0x250] ss:$24 sps:$4 sm:$0xff]   ;;  %v3966_v7 = vld [vmem:[#allocation11 + $0x284] ss:$24 sps:$4 sm:$0xff]   ;;  %v4045_v8 = vld [vmem:[#allocation12 + $0x240] ss:$24 sps:$4 sm:$0xff]  }
 0x229   :  { %1484 = vmatprep.mubr.bf16.mxu1 %v4505_v21  ;;  %1497 = vmatprep.subr.bf16.mxu0 %v3930_v22  ;;  %v3964_v9 = vld [vmem:[#allocation11 + $0x280] ss:$24 sps:$4 sm:$0xff]   ;;  %v3969_v10 = vld [vmem:[#allocation11 + $0x2b4] ss:$24 sps:$4 sm:$0xff]   ;;  %v3967_v11 = vld [vmem:[#allocation11 + $0x2b0] ss:$24 sps:$4 sm:$0xff]  }
 0x22a   :  { %2287 = vmatpush1.bf16.msra.mxu1 %v3973_v23  ;;  %v3972_v12 = vld [vmem:[#allocation11 + $0x2e4] ss:$24 sps:$4 sm:$0xff]   ;;  %v3970_v13 = vld [vmem:[#allocation11 + $0x2e0] ss:$24 sps:$4 sm:$0xff]  }
 0x22b   :  { %2288 = vmatprep.subr.bf16.mxu1 %v3981_v24  ;;  %v3976_v16 = vld [vmem:[#allocation12 + $0x8] ss:$24 sps:$4 sm:$0xff]   ;;  %v3984_v17 = vld [vmem:[#allocation12 + $0x3c] ss:$24 sps:$4 sm:$0xff]   ;;  %v3982_v19 = vld [vmem:[#allocation12 + $0x38] ss:$24 sps:$4 sm:$0xff]  }
 0x22c   :  { %1498 = vmatpush1.bf16.msra.mxu0 %v3928_v25  ;;  %v3990_v22 = vld [vmem:[#allocation12 + $0x6c] ss:$24 sps:$4 sm:$0xff]   ;;  %v3988_v23 = vld [vmem:[#allocation12 + $0x68] ss:$24 sps:$4 sm:$0xff]   ;;  %v3996_v24 = vld [vmem:[#allocation12 + $0x9c] ss:$24 sps:$4 sm:$0xff]  }
 0x22d   :  { %1499 = vmatprep.subr.bf16.mxu0 %v3933_v26  ;;  %v3994_v25 = vld [vmem:[#allocation12 + $0x98] ss:$24 sps:$4 sm:$0xff]   ;;  %v4002_v26 = vld [vmem:[#allocation12 + $0xcc] ss:$24 sps:$4 sm:$0xff]  }
 0x22e   :  { %2289 = vmatpush1.bf16.msra.mxu1 %v3979_v27  ;;  %v4000_v27 = vld [vmem:[#allocation12 + $0xc8] ss:$24 sps:$4 sm:$0xff]  }
 0x22f   :  { %1432 = vmatmul.mubr.bf16.gmra.mrb[8].mxu0 %v4503_v20  ;;  %1485 = vmatmul.mubr.bf16.gmra.mrb[16].mxu1 %v4503_v20 }
 0x230   :  { %1500 = vmatpush1.bf16.msra.mxu0 %v3931_v28  ;;  %1527 = vmatprep.mubr.bf16.mxu0 %v810_v14  ;;  %v3978_v14 = vld [vmem:[#allocation12 + $0xc] ss:$24 sps:$4 sm:$0xff]  }
 0x231   :  { %1501 = vmatprep.subr.bf16.mxu0 %v3936_v29  ;;  %2290 = vmatprep.subr.bf16.mxu1 %v3987_v30  ;;  %v4014_v28 = vld [vmem:[#allocation12 + $0x12c] ss:$24 sps:$4 sm:$0xff]   ;;  %v4012_v30 = vld [vmem:[#allocation12 + $0x128] ss:$24 sps:$4 sm:$0xff]  }
 0x232   :  { %2291 = vmatpush1.bf16.msra.mxu1 %v3985_v31  ;;  %v4053_v29 = vld [vmem:[#allocation12 + $0x274] ss:$24 sps:$4 sm:$0xff]   ;;  %v4051_v31 = vld [vmem:[#allocation12 + $0x270] ss:$24 sps:$4 sm:$0xff]  }
 0x233   :  { %2292 = vmatprep.subr.bf16.mxu1 %v3993_v32  ;;  %v4020_v32 = vld [vmem:[#allocation12 + $0x15c] ss:$24 sps:$4 sm:$0xff]  }
 0x234   :  { %1502 = vmatpush1.bf16.msra.mxu0 %v3934_v33  ;;  %v4018_v33 = vld [vmem:[#allocation12 + $0x158] ss:$24 sps:$4 sm:$0xff]  }
 0x235   :  { %1503 = vmatprep.subr.bf16.mxu0 %v3939_v34  ;;  %v4057_v34 = vld [vmem:[#allocation12 + $0x2a0] ss:$24 sps:$4 sm:$0xff]  }
 0x236   :  { %2293 = vmatpush1.bf16.msra.mxu1 %v3991_v35  ;;  %v4026_v35 = vld [vmem:[#allocation12 + $0x18c] ss:$24 sps:$4 sm:$0xff]  }
 0x237   :  { %2294 = vmatprep.subr.bf16.mxu1 %v3999_v36  ;;  %v4065_v36 = vld [vmem:[#allocation12 + $0x2d4] ss:$24 sps:$4 sm:$0xff]  }
 0x238   :  { %1504 = vmatpush1.bf16.msra.mxu0 %v3937_v37  ;;  %v4024_v37 = vld [vmem:[#allocation12 + $0x188] ss:$24 sps:$4 sm:$0xff]  }
 0x239   :  { %1505 = vmatprep.subr.bf16.mxu0 %v3942_v38  ;;  %v4063_v38 = vld [vmem:[#allocation12 + $0x2d0] ss:$24 sps:$4 sm:$0xff]  }
 0x23a   :  { %2295 = vmatpush1.bf16.msra.mxu1 %v3997_v39  ;;  %v4032_v39 = vld [vmem:[#allocation12 + $0x1bc] ss:$24 sps:$4 sm:$0xff]  }
 0x23b   :  { %2296 = vmatprep.subr.bf16.mxu1 %v4005_v40  ;;  %v4030_v40 = vld [vmem:[#allocation12 + $0x1b8] ss:$24 sps:$4 sm:$0xff]  }
 0x23c   :  { %1506 = vmatpush1.bf16.msra.mxu0 %v3940_v41  ;;  %v4071_v41 = vld [vmem:[#allocation12 + $0x14] ss:$24 sps:$4 sm:$0xff]  }
 0x23d   :  { %1507 = vmatprep.subr.bf16.mxu0 %v3945_v42  ;;  %v4038_v42 = vld [vmem:[#allocation12 + $0x1ec] ss:$24 sps:$4 sm:$0xff]  }
 0x23e   :  { %2297 = vmatpush1.bf16.msra.mxu1 %v4003_v43  ;;  %v4036_v43 = vld [vmem:[#allocation12 + $0x1e8] ss:$24 sps:$4 sm:$0xff]  }
 0x23f   :  { %2298 = vmatprep.subr.bf16.mxu1 %v4011_v44  ;;  %v4044_v44 = vld [vmem:[#allocation12 + $0x21c] ss:$24 sps:$4 sm:$0xff]  }
 0x240   :  { %1508 = vmatpush1.bf16.msra.mxu0 %v3943_v45  ;;  %v4042_v45 = vld [vmem:[#allocation12 + $0x218] ss:$24 sps:$4 sm:$0xff]  }
 0x241   :  { %1509 = vmatprep.subr.bf16.mxu0 %v3948_v46  ;;  %v4050_v46 = vld [vmem:[#allocation12 + $0x24c] ss:$24 sps:$4 sm:$0xff]  }
 0x242   :  { %2299 = vmatpush1.bf16.msra.mxu1 %v4009_v47  ;;  %v4048_v47 = vld [vmem:[#allocation12 + $0x248] ss:$24 sps:$4 sm:$0xff]  }
 0x243   :  { %2300 = vmatprep.subr.bf16.mxu1 %v4017_v48  ;;  %v4056_v48 = vld [vmem:[#allocation12 + $0x27c] ss:$24 sps:$4 sm:$0xff]  }
 0x244   :  { %1510 = vmatpush1.bf16.msra.mxu0 %v3946_v49  ;;  %v4054_v49 = vld [vmem:[#allocation12 + $0x278] ss:$24 sps:$4 sm:$0xff]  }
 0x245   :  { %1511 = vmatprep.subr.bf16.mxu0 %v3951_v50  ;;  %v4062_v50 = vld [vmem:[#allocation12 + $0x2ac] ss:$24 sps:$4 sm:$0xff]  }
 0x246   :  { %2301 = vmatpush1.bf16.msra.mxu1 %v4015_v51  ;;  %v4060_v51 = vld [vmem:[#allocation12 + $0x2a8] ss:$24 sps:$4 sm:$0xff]  }
 0x247   :  { %2302 = vmatprep.subr.bf16.mxu1 %v4023_v52  ;;  %v4068_v52 = vld [vmem:[#allocation12 + $0x2dc] ss:$24 sps:$4 sm:$0xff]  }
 0x248   :  { %1512 = vmatpush1.bf16.msra.mxu0 %v3949_v53  ;;  %v4066_v53 = vld [vmem:[#allocation12 + $0x2d8] ss:$24 sps:$4 sm:$0xff]  }
 0x249   :  { %1513 = vmatprep.subr.bf16.mxu0 %v3954_v54  ;;  %v4119_v54 = vld [vmem:[#allocation14 + $0x4] ss:$12 sps:$4 sm:$0xff]  }
 0x24a   :  { %2303 = vmatpush1.bf16.msra.mxu1 %v4021_v55  ;;  %v1644_v55 = vld [vmem:[%s4653_s6] sm:$0x3] }
 0x24b   :  { %2304 = vmatprep.subr.bf16.mxu1 %v4029_v56  ;;  %v4520_v56 = vrot.slane %v1644_v55, %v4486_v15 }
 0x24c   :  { %1514 = vmatpush1.bf16.msra.mxu0 %v3952_v57  ;;  %v4523_v57 = vrot.slane %v1644_v55, %v4491_v18  ;;  %v4137_v55 = vld [vmem:[#allocation14 + $0x94] ss:$12 sps:$4 sm:$0xff]  }
 0x24d   :  { %1515 = vmatprep.subr.bf16.mxu0 %v3957_v58 }
 0x24e   :  { %2305 = vmatpush1.bf16.msra.mxu1 %v4027_v59 }
 0x24f   :  { %2306 = vmatprep.subr.bf16.mxu1 %v4035_v60 }
 0x250   :  { %1516 = vmatpush1.bf16.msra.mxu0 %v3955_v61 }
 0x251   :  { %1517 = vmatprep.subr.bf16.mxu0 %v3960_v62 }
 0x252   :  { %2307 = vmatpush1.bf16.msra.mxu1 %v4033_v63 }
 0x253   :  { %2308 = vmatprep.subr.bf16.mxu1 %v4041_v0 }
 0x254   :  { %1518 = vmatpush1.bf16.msra.mxu0 %v3958_v1 }
 0x255   :  { %1519 = vmatprep.subr.bf16.mxu0 %v3963_v2 }
 0x256   :  { %2309 = vmatpush1.bf16.msra.mxu1 %v4039_v4 }
 0x257   :  { %2310 = vmatprep.subr.bf16.mxu1 %v4047_v5 }
 0x258   :  { %1520 = vmatpush1.bf16.msra.mxu0 %v3961_v6 }
 0x259   :  { %1521 = vmatprep.subr.bf16.mxu0 %v3966_v7 }
 0x25a   :  { %2311 = vmatpush1.bf16.msra.mxu1 %v4045_v8 }
 0x25b   :  { %2312 = vmatprep.subr.bf16.mxu1 %v4053_v29 }
 0x25c   :  { %1522 = vmatpush1.bf16.msra.mxu0 %v3964_v9 }
 0x25d   :  { %1523 = vmatprep.subr.bf16.mxu0 %v3969_v10 }
 0x25e   :  { %2313 = vmatpush1.bf16.msra.mxu1 %v4051_v31 }
 0x260   :  { %1524 = vmatpush1.bf16.msra.mxu0 %v3967_v11 }
 0x261   :  { %1525 = vmatprep.subr.bf16.mxu0 %v3972_v12 }
 0x264   :  { %1526 = vmatpush1.bf16.msra.mxu0 %v3970_v13 }
 0x265   :  { %2349 = vmatprep.subr.bf16.mxu0 %v3978_v14 }
 0x267   :  { %1528 = vmatmul.mubr.bf16.vlgmr.msra.gmra.mrb[12].mxu0 %v4500_v3  ;;  %v4008_v3 = vld [vmem:[#allocation12 + $0xfc] ss:$24 sps:$4 sm:$0xff]  }
 0x268   :  { %1537 = vmatprep.mubr.bf16.mxu0 %v4505_v21  ;;  %2350 = vmatpush1.bf16.msra.mxu0 %v3976_v16  ;;  %v4006_v21 = vld [vmem:[#allocation12 + $0xf8] ss:$24 sps:$4 sm:$0xff]  }
 0x269   :  { %2351 = vmatprep.subr.bf16.mxu0 %v3984_v17 }
 0x26c   :  { %2352 = vmatpush1.bf16.msra.mxu0 %v3982_v19 }
 0x26d   :  { %2353 = vmatprep.subr.bf16.mxu0 %v3990_v22 }
 0x26f   :  { %1538 = vmatmul.mubr.bf16.gmra.mrb[16].mxu0 %v4503_v20  ;;  %v4059_v20 = vld [vmem:[#allocation12 + $0x2a4] ss:$24 sps:$4 sm:$0xff]  }
 0x270   :  { %2354 = vmatpush1.bf16.msra.mxu0 %v3988_v23  ;;  %2314 = vmatprep.subr.bf16.mxu1 %v4059_v20  ;;  %v4117_v20 = vld [vmem:[#allocation14] ss:$12 sps:$4 sm:$0xff]  }
 0x271   :  { %2355 = vmatprep.subr.bf16.mxu0 %v3996_v24  ;;  %2315 = vmatpush1.bf16.msra.mxu1 %v4057_v34  ;;  %v4074_v34 = vld [vmem:[#allocation12 + $0x44] ss:$24 sps:$4 sm:$0xff]  }
 0x272   :  { %2316 = vmatprep.subr.bf16.mxu1 %v4065_v36  ;;  %v4072_v36 = vld [vmem:[#allocation12 + $0x40] ss:$24 sps:$4 sm:$0xff]  }
 0x274   :  { %2356 = vmatpush1.bf16.msra.mxu0 %v3994_v25 }
 0x275   :  { %2357 = vmatprep.subr.bf16.mxu0 %v4002_v26  ;;  %2317 = vmatpush1.bf16.msra.mxu1 %v4063_v38  ;;  %v4077_v38 = vld [vmem:[#allocation12 + $0x74] ss:$24 sps:$4 sm:$0xff]  }
 0x276   :  { %2412 = vmatprep.subr.bf16.mxu1 %v4071_v41  ;;  %v4123_v41 = vld [vmem:[#allocation14 + $0x30] ss:$12 sps:$4 sm:$0xff]  }
 0x278   :  { %2358 = vmatpush1.bf16.msra.mxu0 %v4000_v27 }
 0x279   :  { %2359 = vmatprep.subr.bf16.mxu0 %v4008_v3 }
 0x27c   :  { %2360 = vmatpush1.bf16.msra.mxu0 %v4006_v21 }
 0x27d   :  { %2361 = vmatprep.subr.bf16.mxu0 %v4014_v28 }
 0x280   :  { %2362 = vmatpush1.bf16.msra.mxu0 %v4012_v30 }
 0x281   :  { %2363 = vmatprep.subr.bf16.mxu0 %v4020_v32  ;;  %v4069_v32 = vld [vmem:[#allocation12 + $0x10] ss:$24 sps:$4 sm:$0xff]  }
 0x284   :  { %2364 = vmatpush1.bf16.msra.mxu0 %v4018_v33 }
 0x285   :  { %2365 = vmatprep.subr.bf16.mxu0 %v4026_v35  ;;  %v4122_v35 = vld [vmem:[#allocation14 + $0x1c] ss:$12 sps:$4 sm:$0xff]  }
 0x288   :  { %2366 = vmatpush1.bf16.msra.mxu0 %v4024_v37  ;;  %v4120_v37 = vld [vmem:[#allocation14 + $0x18] ss:$12 sps:$4 sm:$0xff]  }
 0x289   :  { %2367 = vmatprep.subr.bf16.mxu0 %v4032_v39  ;;  %v4125_v39 = vld [vmem:[#allocation14 + $0x34] ss:$12 sps:$4 sm:$0xff]  }
 0x28c   :  { %2368 = vmatpush1.bf16.msra.mxu0 %v4030_v40  ;;  %v4075_v40 = vld [vmem:[#allocation12 + $0x70] ss:$24 sps:$4 sm:$0xff]  }
 0x28d   :  { %2369 = vmatprep.subr.bf16.mxu0 %v4038_v42  ;;  %v4080_v42 = vld [vmem:[#allocation12 + $0xa4] ss:$24 sps:$4 sm:$0xff]  }
 0x290   :  { %2370 = vmatpush1.bf16.msra.mxu0 %v4036_v43  ;;  %v4128_v43 = vld [vmem:[#allocation14 + $0x4c] ss:$12 sps:$4 sm:$0xff]  }
 0x291   :  { %2371 = vmatprep.subr.bf16.mxu0 %v4044_v44  ;;  %v4078_v44 = vld [vmem:[#allocation12 + $0xa0] ss:$24 sps:$4 sm:$0xff]  }
 0x294   :  { %2372 = vmatpush1.bf16.msra.mxu0 %v4042_v45  ;;  %v4126_v45 = vld [vmem:[#allocation14 + $0x48] ss:$12 sps:$4 sm:$0xff]  }
 0x295   :  { %2373 = vmatprep.subr.bf16.mxu0 %v4050_v46  ;;  %v4083_v46 = vld [vmem:[#allocation12 + $0xd4] ss:$24 sps:$4 sm:$0xff]  }
 0x298   :  { %2374 = vmatpush1.bf16.msra.mxu0 %v4048_v47  ;;  %v4131_v47 = vld [vmem:[#allocation14 + $0x64] ss:$12 sps:$4 sm:$0xff]  }
 0x299   :  { %2375 = vmatprep.subr.bf16.mxu0 %v4056_v48  ;;  %v4081_v48 = vld [vmem:[#allocation12 + $0xd0] ss:$24 sps:$4 sm:$0xff]  }
 0x29c   :  { %2376 = vmatpush1.bf16.msra.mxu0 %v4054_v49  ;;  %v4129_v49 = vld [vmem:[#allocation14 + $0x60] ss:$12 sps:$4 sm:$0xff]  }
 0x29d   :  { %2377 = vmatprep.subr.bf16.mxu0 %v4062_v50  ;;  %v4086_v50 = vld [vmem:[#allocation12 + $0x104] ss:$24 sps:$4 sm:$0xff]  }
 0x2a0   :  { %2378 = vmatpush1.bf16.msra.mxu0 %v4060_v51  ;;  %v4134_v51 = vld [vmem:[#allocation14 + $0x7c] ss:$12 sps:$4 sm:$0xff]  }
 0x2a1   :  { %2379 = vmatprep.subr.bf16.mxu0 %v4068_v52  ;;  %v4084_v52 = vld [vmem:[#allocation12 + $0x100] ss:$24 sps:$4 sm:$0xff]  }
 0x2a4   :  { %2380 = vmatpush1.bf16.msra.mxu0 %v4066_v53  ;;  %v4132_v53 = vld [vmem:[#allocation14 + $0x78] ss:$12 sps:$4 sm:$0xff]  }
 0x2a5   :  { %3019 = vmatprep.subr.bf16.mxu0 %v4119_v54  ;;  %v4089_v54 = vld [vmem:[#allocation12 + $0x134] ss:$24 sps:$4 sm:$0xff]  }
 0x2fa   :  { %v1423_v58 = vpop.f32.mrb[4].mxu0  ;;  %v1476_v59 = vpop.f32.mrb[12].mxu1 }
 0x2fb   :  { %v1656_v60 = vadd.f32 %v4520_v56, %v1423_v58  ;;  %v1425_v61 = vpop.f32.mrb[5].mxu0  ;;  %v1478_v62 = vpop.f32.mrb[13].mxu1  ;;  %v4087_v58 = vld [vmem:[#allocation12 + $0x130] ss:$24 sps:$4 sm:$0xff]  }
 0x2fc   :  { %v1657_v63 = vadd.f32 %v4523_v57, %v1425_v61  ;;  %v1427_v0 = vpop.f32.mrb[6].mxu0  ;;  %v1480_v1 = vpop.f32.mrb[14].mxu1  ;;  %v4140_v61 = vld [vmem:[#allocation14 + $0xac] ss:$12 sps:$4 sm:$0xff]  }
 0x2fd   :  { %v1592_v2 = vadd.f32 %v1476_v59, %v1427_v0  ;;  %v1429_v4 = vpop.f32.mrb[7].mxu0  ;;  %v1482_v5 = vpop.f32.mrb[15].mxu1  ;;  %v1680_v7 = vmul.f32 0.01, %v1656_v60  ;;  %vm1668_vm9 = vcmp.ge.f32.partialorder %v1656_v60, 0.0 }
 0x2fe   :  { %v1593_v6 = vadd.f32 %v1478_v62, %v1429_v4  ;;  %v1681_v9 = vmul.f32 0.01, %v1657_v63  ;;  %vm1669_vm10 = vcmp.ge.f32.partialorder %v1657_v63, 0.0  ;;  %v4135_v59 = vld [vmem:[#allocation14 + $0x90] ss:$12 sps:$4 sm:$0xff]  }
 0x2ff   :  { %v1658_v8 = vadd.f32 %v4520_v56, %v1592_v2  ;;  %v1692_v16 = vsel %vm1668_vm9, %v1656_v60, %v1680_v7  ;;  %v4092_v60 = vld [vmem:[#allocation12 + $0x164] ss:$24 sps:$4 sm:$0xff]   ;;  %v4090_v62 = vld [vmem:[#allocation12 + $0x160] ss:$24 sps:$4 sm:$0xff]   ;;  %v4095_v0 = vld [vmem:[#allocation12 + $0x194] ss:$24 sps:$4 sm:$0xff]  }
 0x300   :  { %v1659_v10 = vadd.f32 %v4523_v57, %v1593_v6  ;;  %v1693_v3 = vsel %vm1669_vm10, %v1657_v63, %v1681_v9  ;;  %v4138_v63 = vld [vmem:[#allocation14 + $0xa8] ss:$12 sps:$4 sm:$0xff]   ;;  %v4141_v4 = vld [vmem:[#allocation14 + $0xc0] ss:$12 sps:$4 sm:$0xff]  }
 0x301   :  { %vm1670_vm11 = vcmp.ge.f32.partialorder %v1658_v8, 0.0  ;;  %v1682_v11 = vmul.f32 0.01, %v1658_v8  ;;  %v4093_v2 = vld [vmem:[#allocation12 + $0x190] ss:$24 sps:$4 sm:$0xff]  }
 0x302   :  { %vm1671_vm12 = vcmp.ge.f32.partialorder %v1659_v10, 0.0  ;;  %v1683_v12 = vmul.f32 0.01, %v1659_v10  ;;  %v1433_v13 = vpop.f32.mrb[8].mxu0  ;;  %v1486_v14 = vpop.f32.mrb[16].mxu1 }
 0x303   :  { %v1694_v17 = vsel %vm1670_vm11, %v1658_v8, %v1682_v11  ;;  %v4529_v19 = vadd.f32 %v1480_v1, %v1433_v13  ;;  %v1435_v22 = vpop.f32.mrb[9].mxu0  ;;  %v1488_v23 = vpop.f32.mrb[17].mxu1  ;;  %v4143_v1 = vld [vmem:[#allocation14 + $0xc4] ss:$12 sps:$4 sm:$0xff]   ;;  %v4148_v6 = vld [vmem:[#allocation14 + $0xdc] ss:$12 sps:$4 sm:$0xff]  }
 0x304   :  { %v4531_v24 = vpack.c.bf16 %v1694_v17, %v1692_v16  ;;  %v4533_v25 = vadd.f32 %v1482_v5, %v1435_v22  ;;  %v1437_v26 = vpop.f32.mrb[10].mxu0  ;;  %v4535_v27 = vpop.f32.mrb[18].mxu1  ;;  %v1695_v21 = vsel %vm1671_vm12, %v1659_v10, %v1683_v12  ;;  %v4098_v5 = vld [vmem:[#allocation12 + $0x1c4] ss:$24 sps:$4 sm:$0xff]   ;;  %v4096_v7 = vld [vmem:[#allocation12 + $0x1c0] ss:$24 sps:$4 sm:$0xff]  }
 0x305   :  { %v4538_v28 = vadd.f32 %v1486_v14, %v1437_v26  ;;  %v1439_v29 = vpop.f32.mrb[11].mxu0  ;;  %v4540_v30 = vpop.f32.mrb[19].mxu1  ;;  %v4542_v31 = vpack.c.bf16 %v1695_v21, %v1693_v3  ;;  %v4146_v8 = vld [vmem:[#allocation14 + $0xd8] ss:$12 sps:$4 sm:$0xff]   ;;  %v4101_v9 = vld [vmem:[#allocation12 + $0x1f4] ss:$24 sps:$4 sm:$0xff]  }
 0x306   :  { %v4544_v33 = vadd.f32 %v1488_v23, %v1439_v29  ;;  %v4153_v10 = vld [vmem:[#allocation14 + $0xf4] ss:$12 sps:$4 sm:$0xff]   ;;  %v4099_v11 = vld [vmem:[#allocation12 + $0x1f0] ss:$24 sps:$4 sm:$0xff]   ;;  %v4104_v13 = vld [vmem:[#allocation12 + $0x224] ss:$24 sps:$4 sm:$0xff]  }
 0x307   :  { %2318 = vmatprep.mubr.bf16.mxu1 %v4542_v31  ;;  %2381 = vmatprep.mubr.bf16.mxu0 %v4542_v31  ;;  %v4151_v12 = vld [vmem:[#allocation14 + $0xf0] ss:$12 sps:$4 sm:$0xff]   ;;  %v4158_v14 = vld [vmem:[#allocation14 + $0x10c] ss:$12 sps:$4 sm:$0xff]   ;;  %v4156_v17 = vld [vmem:[#allocation14 + $0x108] ss:$12 sps:$4 sm:$0xff]  }
 0x308   :  { %2319 = vmatmul.mubr.bf16.vlgmr.msra.gmra.mrb[20].mxu1 %v4531_v24  ;;  %2382 = vmatmul.mubr.bf16.vlgmr.msra.gmra.mrb[20].mxu0 %v4531_v24  ;;  %v4102_v16 = vld [vmem:[#allocation12 + $0x220] ss:$24 sps:$4 sm:$0xff]   ;;  %v4107_v22 = vld [vmem:[#allocation12 + $0x254] ss:$24 sps:$4 sm:$0xff]   ;;  %v4163_v23 = vld [vmem:[#allocation14 + $0x124] ss:$12 sps:$4 sm:$0xff]  }
 0x309   :  { %2413 = vmatpush1.bf16.msra.mxu1 %v4069_v32  ;;  %3020 = vmatpush1.bf16.msra.mxu0 %v4117_v20  ;;  %v4105_v26 = vld [vmem:[#allocation12 + $0x250] ss:$24 sps:$4 sm:$0xff]   ;;  %v4161_v3 = vld [vmem:[#allocation14 + $0x120] ss:$12 sps:$4 sm:$0xff]   ;;  %v4110_v21 = vld [vmem:[#allocation12 + $0x284] ss:$24 sps:$4 sm:$0xff]  }
 0x30a   :  { %2414 = vmatprep.subr.bf16.mxu1 %v4074_v34  ;;  %3021 = vmatprep.subr.bf16.mxu0 %v4122_v35  ;;  %v4108_v29 = vld [vmem:[#allocation12 + $0x280] ss:$24 sps:$4 sm:$0xff]   ;;  %v4113_v20 = vld [vmem:[#allocation12 + $0x2b4] ss:$24 sps:$4 sm:$0xff]  }
 0x30d   :  { %2415 = vmatpush1.bf16.msra.mxu1 %v4072_v36  ;;  %3022 = vmatpush1.bf16.msra.mxu0 %v4120_v37 }
 0x30e   :  { %2416 = vmatprep.subr.bf16.mxu1 %v4077_v38  ;;  %3023 = vmatprep.subr.bf16.mxu0 %v4125_v39 }
 0x311   :  { %2417 = vmatpush1.bf16.msra.mxu1 %v4075_v40  ;;  %3024 = vmatpush1.bf16.msra.mxu0 %v4123_v41  ;;  %v4111_v41 = vld [vmem:[#allocation12 + $0x2b0] ss:$24 sps:$4 sm:$0xff]  }
 0x312   :  { %2418 = vmatprep.subr.bf16.mxu1 %v4080_v42  ;;  %3025 = vmatprep.subr.bf16.mxu0 %v4128_v43 }
 0x315   :  { %2419 = vmatpush1.bf16.msra.mxu1 %v4078_v44  ;;  %3026 = vmatpush1.bf16.msra.mxu0 %v4126_v45  ;;  %v4116_v44 = vld [vmem:[#allocation12 + $0x2e4] ss:$24 sps:$4 sm:$0xff]  }
 0x316   :  { %2420 = vmatprep.subr.bf16.mxu1 %v4083_v46  ;;  %3027 = vmatprep.subr.bf16.mxu0 %v4131_v47 }
 0x319   :  { %2421 = vmatpush1.bf16.msra.mxu1 %v4081_v48  ;;  %3028 = vmatpush1.bf16.msra.mxu0 %v4129_v49 }
 0x31a   :  { %2422 = vmatprep.subr.bf16.mxu1 %v4086_v50  ;;  %3029 = vmatprep.subr.bf16.mxu0 %v4134_v51  ;;  %v4144_v50 = vld [vmem:[#allocation14 + $0xc8] ss:$12 sps:$4 sm:$0xff]  }
 0x31d   :  { %2423 = vmatpush1.bf16.msra.mxu1 %v4084_v52  ;;  %3030 = vmatpush1.bf16.msra.mxu0 %v4132_v53 }
 0x31e   :  { %2424 = vmatprep.subr.bf16.mxu1 %v4089_v54  ;;  %3031 = vmatprep.subr.bf16.mxu0 %v4137_v55 }
 0x321   :  { %2425 = vmatpush1.bf16.msra.mxu1 %v4087_v58  ;;  %3032 = vmatpush1.bf16.msra.mxu0 %v4135_v59 }
 0x322   :  { %2426 = vmatprep.subr.bf16.mxu1 %v4092_v60  ;;  %3033 = vmatprep.subr.bf16.mxu0 %v4140_v61 }
 0x325   :  { %2427 = vmatpush1.bf16.msra.mxu1 %v4090_v62  ;;  %3034 = vmatpush1.bf16.msra.mxu0 %v4138_v63 }
 0x326   :  { %2428 = vmatprep.subr.bf16.mxu1 %v4095_v0  ;;  %3035 = vmatprep.subr.bf16.mxu0 %v4143_v1 }
 0x329   :  { %2429 = vmatpush1.bf16.msra.mxu1 %v4093_v2  ;;  %3036 = vmatpush1.bf16.msra.mxu0 %v4141_v4 }
 0x32a   :  { %2430 = vmatprep.subr.bf16.mxu1 %v4098_v5  ;;  %3037 = vmatprep.subr.bf16.mxu0 %v4148_v6 }
 0x32d   :  { %2431 = vmatpush1.bf16.msra.mxu1 %v4096_v7  ;;  %3038 = vmatpush1.bf16.msra.mxu0 %v4146_v8 }
 0x32e   :  { %2432 = vmatprep.subr.bf16.mxu1 %v4101_v9  ;;  %3039 = vmatprep.subr.bf16.mxu0 %v4153_v10 }
 0x331   :  { %2433 = vmatpush1.bf16.msra.mxu1 %v4099_v11  ;;  %3040 = vmatpush1.bf16.msra.mxu0 %v4151_v12  ;;  %v4149_v11 = vld [vmem:[#allocation14 + $0xe0] ss:$12 sps:$4 sm:$0xff]  }
 0x332   :  { %2434 = vmatprep.subr.bf16.mxu1 %v4104_v13  ;;  %3041 = vmatprep.subr.bf16.mxu0 %v4158_v14  ;;  %v4150_v12 = vld [vmem:[#allocation14 + $0x20] ss:$12 sps:$4 sm:$0xff]   ;;  %v4154_v13 = vld [vmem:[#allocation14 + $0xf8] ss:$12 sps:$4 sm:$0xff]   ;;  %v4168_v14 = vld [vmem:[#allocation14 + $0x13c] ss:$12 sps:$4 sm:$0xff]  }
 0x335   :  { %2435 = vmatpush1.bf16.msra.mxu1 %v4102_v16  ;;  %3042 = vmatpush1.bf16.msra.mxu0 %v4156_v17  ;;  %v4155_v16 = vld [vmem:[#allocation14 + $0x38] ss:$12 sps:$4 sm:$0xff]  }
 0x336   :  { %2436 = vmatprep.subr.bf16.mxu1 %v4107_v22  ;;  %3043 = vmatprep.subr.bf16.mxu0 %v4163_v23  ;;  %v4166_v17 = vld [vmem:[#allocation14 + $0x138] ss:$12 sps:$4 sm:$0xff]   ;;  %v4159_v22 = vld [vmem:[#allocation14 + $0x110] ss:$12 sps:$4 sm:$0xff]   ;;  %v4173_v23 = vld [vmem:[#allocation14 + $0x154] ss:$12 sps:$4 sm:$0xff]  }
 0x339   :  { %2437 = vmatpush1.bf16.msra.mxu1 %v4105_v26  ;;  %3044 = vmatpush1.bf16.msra.mxu0 %v4161_v3  ;;  %v4171_v26 = vld [vmem:[#allocation14 + $0x150] ss:$12 sps:$4 sm:$0xff]   ;;  %v4178_v3 = vld [vmem:[#allocation14 + $0x16c] ss:$12 sps:$4 sm:$0xff]  }
 0x33a   :  { %v1529_v32 = vpop.f32.mrb[12].mxu0  ;;  %2438 = vmatprep.subr.bf16.mxu1 %v4110_v21  ;;  %3045 = vmatprep.subr.bf16.mxu0 %v4168_v14  ;;  %v4165_v21 = vld [vmem:[#allocation14 + $0x68] ss:$12 sps:$4 sm:$0xff]  }
 0x33b   :  { %v1616_v34 = vadd.f32 %v4529_v19, %v1529_v32  ;;  %v1531_v35 = vpop.f32.mrb[13].mxu0  ;;  %v4169_v32 = vld [vmem:[#allocation14 + $0x140] ss:$12 sps:$4 sm:$0xff]  }
 0x33c   :  { %v1617_v36 = vadd.f32 %v4533_v25, %v1531_v35  ;;  %v1533_v37 = vpop.f32.mrb[14].mxu0  ;;  %v4175_v35 = vld [vmem:[#allocation14 + $0x98] ss:$12 sps:$4 sm:$0xff]  }
 0x33d   :  { %v1660_v38 = vadd.f32 %v4520_v56, %v1616_v34  ;;  %v1618_v39 = vadd.f32 %v4538_v28, %v1533_v37  ;;  %v1535_v40 = vpop.f32.mrb[15].mxu0  ;;  %2439 = vmatpush1.bf16.msra.mxu1 %v4108_v29  ;;  %v4114_v28 = vld [vmem:[#allocation12 + $0x2e0] ss:$24 sps:$4 sm:$0xff]   ;;  %3046 = vmatpush1.bf16.msra.mxu0 %v4166_v17  ;;  %v4176_v29 = vld [vmem:[#allocation14 + $0x168] ss:$12 sps:$4 sm:$0xff]  }
 0x33e   :  { %v1661_v42 = vadd.f32 %v4523_v57, %v1617_v36  ;;  %v1619_v43 = vadd.f32 %v4544_v33, %v1535_v40  ;;  %2440 = vmatprep.subr.bf16.mxu1 %v4113_v20  ;;  %3047 = vmatprep.subr.bf16.mxu0 %v4173_v23  ;;  %v4170_v20 = vld [vmem:[#allocation14 + $0x80] ss:$12 sps:$4 sm:$0xff]   ;;  %v4174_v34 = vld [vmem:[#allocation14 + $0x158] ss:$12 sps:$4 sm:$0xff]   ;;  %v4179_v36 = vld [vmem:[#allocation14 + $0x170] ss:$12 sps:$4 sm:$0xff]  }
 0x33f   :  { %v1684_v45 = vmul.f32 0.01, %v1660_v38  ;;  %v1662_v19 = vadd.f32 %v4520_v56, %v1618_v39  ;;  %vm1672_vm13 = vcmp.ge.f32.partialorder %v1660_v38, 0.0  ;;  %v4180_v37 = vld [vmem:[#allocation14 + $0xb0] ss:$12 sps:$4 sm:$0xff]  }
 0x340   :  { %v1685_v46 = vmul.f32 0.01, %v1661_v42  ;;  %v1663_v25 = vadd.f32 %v4523_v57, %v1619_v43  ;;  %vm1673_vm14 = vcmp.ge.f32.partialorder %v1661_v42, 0.0 }
 0x341   :  { %vm1674_vm15 = vcmp.ge.f32.partialorder %v1662_v19, 0.0  ;;  %v1686_v47 = vmul.f32 0.01, %v1662_v19  ;;  %2441 = vmatpush1.bf16.msra.mxu1 %v4111_v41  ;;  %v1696_v52 = vsel %vm1672_vm13, %v1660_v38, %v1684_v45  ;;  %3048 = vmatpush1.bf16.msra.mxu0 %v4171_v26  ;;  %v2615_v38 = vld [vmem:[%s4655_s8] sm:$0x3] }
 0x342   :  { %vm1675_vm0 = vcmp.ge.f32.partialorder %v1663_v25, 0.0  ;;  %v1687_v48 = vmul.f32 0.01, %v1663_v25  ;;  %v1539_v49 = vpop.f32.mrb[16].mxu0  ;;  %2442 = vmatprep.subr.bf16.mxu1 %v4116_v44  ;;  %v1697_v58 = vsel %vm1673_vm14, %v1661_v42, %v1685_v46  ;;  %3049 = vmatprep.subr.bf16.mxu0 %v4178_v3  ;;  %v4571_v39 = vrot.slane %v2615_v38, %v4486_v15 }
 0x343   :  { %v1620_v33 = vadd.f32 %v1539_v49, %v4535_v27  ;;  %v1541_v51 = vpop.f32.mrb[17].mxu0  ;;  %v1698_v53 = vsel %vm1674_vm15, %v1662_v19, %v1686_v47  ;;  %v4574_v40 = vrot.slane %v2615_v38, %v4491_v18 }
 0x344   :  { %v1621_v54 = vadd.f32 %v1541_v51, %v4540_v30  ;;  %v1543_v55 = vpop.f32.mrb[18].mxu0  ;;  %v1699_v59 = vsel %vm1675_vm0, %v1663_v25, %v1687_v48  ;;  %v1706_v60 = vpack.c.bf16 %v1698_v53, %v1696_v52 }
 0x345   :  { %v1664_v61 = vadd.f32 %v4520_v56, %v1620_v33  ;;  %v1666_v62 = vadd.f32 %v4520_v56, %v1543_v55  ;;  %v1545_v63 = vpop.f32.mrb[19].mxu0  ;;  %v1707_v0 = vpack.c.bf16 %v1699_v59, %v1697_v58  ;;  %2443 = vmatpush1.bf16.msra.mxu1 %v4114_v28  ;;  %3050 = vmatpush1.bf16.msra.mxu0 %v4176_v29 }
 0x346   :  { %v1665_v1 = vadd.f32 %v4523_v57, %v1621_v54  ;;  %v1667_v27 = vadd.f32 %v4523_v57, %v1545_v63  ;;  %3669 = vmatprep.subr.bf16.mxu1 %v4144_v50  ;;  %v4145_v57 = vld [vmem:[#allocation14 + $0x8] ss:$12 sps:$4 sm:$0xff]  }
 0x347   :  { %vm1676_vm1 = vcmp.ge.f32.partialorder %v1664_v61, 0.0  ;;  %v1688_v2 = vmul.f32 0.01, %v1664_v61  ;;  %vm1678_vm2 = vcmp.ge.f32.partialorder %v1666_v62, 0.0  ;;  %v1690_v30 = vmul.f32 0.01, %v1666_v62  ;;  %2328 = vmatprep.mubr.bf16.mxu1 %v1707_v0  ;;  %2391 = vmatprep.mubr.bf16.mxu0 %v1707_v0 }
 0x348   :  { %vm1677_vm3 = vcmp.ge.f32.partialorder %v1665_v1, 0.0  ;;  %v1689_v4 = vmul.f32 0.01, %v1665_v1  ;;  %vm1679_vm4 = vcmp.ge.f32.partialorder %v1667_v27, 0.0  ;;  %v1691_v5 = vmul.f32 0.01, %v1667_v27  ;;  %2329 = vmatmul.mubr.bf16.gmra.mrb[24].mxu1 %v1706_v60  ;;  %2392 = vmatmul.mubr.bf16.gmra.mrb[24].mxu0 %v1706_v60 }
 0x349   :  { %v1700_v56 = vsel %vm1676_vm1, %v1664_v61, %v1688_v2  ;;  %v1702_v6 = vsel %vm1678_vm2, %v1666_v62, %v1690_v30 }
 0x34a   :  { %v1701_v7 = vsel %vm1677_vm3, %v1665_v1, %v1689_v4  ;;  %v1703_v8 = vsel %vm1679_vm4, %v1667_v27, %v1691_v5  ;;  %v1708_v9 = vpack.c.bf16 %v1702_v6, %v1700_v56 }
 0x34b   :  { %v1709_v10 = vpack.c.bf16 %v1703_v8, %v1701_v7 }
 0x34d   :  { %2338 = vmatprep.mubr.bf16.mxu1 %v1709_v10  ;;  %2401 = vmatprep.mubr.bf16.mxu0 %v1709_v10 }
 0x350   :  { %2339 = vmatmul.mubr.bf16.gmra.mrb[28].mxu1 %v1708_v9  ;;  %2402 = vmatmul.mubr.bf16.gmra.mrb[28].mxu0 %v1708_v9 }
 0x351   :  { %2444 = vmatprep.mubr.bf16.mxu1 %v4542_v31  ;;  %v4160_v31 = vld [vmem:[#allocation14 + $0x50] ss:$12 sps:$4 sm:$0xff]  }
 0x358   :  { %2445 = vmatmul.mubr.bf16.vlgmr.msra.gmra.mrb[32].mxu1 %v4531_v24  ;;  %v4164_v24 = vld [vmem:[#allocation14 + $0x128] ss:$12 sps:$4 sm:$0xff]  }
 0x359   :  { %2454 = vmatprep.mubr.bf16.mxu1 %v1707_v0  ;;  %3670 = vmatpush3.bf16.msra.mxu1 %v4145_v57 }
 0x35a   :  { %3671 = vmatprep.subr.bf16.mxu1 %v4149_v11 }
 0x35d   :  { %3672 = vmatpush3.bf16.msra.mxu1 %v4150_v12 }
 0x35e   :  { %3673 = vmatprep.subr.bf16.mxu1 %v4154_v13 }
 0x360   :  { %2455 = vmatmul.mubr.bf16.gmra.mrb[36].mxu1 %v1706_v60 }
 0x361   :  { %2464 = vmatprep.mubr.bf16.mxu1 %v1709_v10  ;;  %3674 = vmatpush3.bf16.msra.mxu1 %v4155_v16 }
 0x362   :  { %3675 = vmatprep.subr.bf16.mxu1 %v4159_v22 }
 0x365   :  { %3676 = vmatpush3.bf16.msra.mxu1 %v4160_v31 }
 0x366   :  { %3677 = vmatprep.subr.bf16.mxu1 %v4164_v24 }
 0x368   :  { %2465 = vmatmul.mubr.bf16.gmra.mrb[40].mxu1 %v1708_v9 }
 0x369   :  { %3678 = vmatpush3.bf16.msra.mxu1 %v4165_v21 }
 0x36a   :  { %3679 = vmatprep.subr.bf16.mxu1 %v4169_v32 }
 0x36d   :  { %3680 = vmatpush3.bf16.msra.mxu1 %v4170_v20 }
 0x36e   :  { %3681 = vmatprep.subr.bf16.mxu1 %v4174_v34 }
 0x371   :  { %3682 = vmatpush3.bf16.msra.mxu1 %v4175_v35 }
 0x372   :  { %3683 = vmatprep.subr.bf16.mxu1 %v4179_v36 }
 0x375   :  { %3684 = vmatpush3.bf16.msra.mxu1 %v4180_v37 }
 0x3db   :  { %v2320_v41 = vpop.f32.mrb[20].mxu1  ;;  %v2383_v42 = vpop.f32.mrb[20].mxu0 }
 0x3dc   :  { %v2627_v43 = vadd.f32 %v4571_v39, %v2320_v41  ;;  %v2322_v44 = vpop.f32.mrb[21].mxu1  ;;  %v2385_v45 = vpop.f32.mrb[21].mxu0 }
 0x3dd   :  { %v2628_v19 = vadd.f32 %v4574_v40, %v2322_v44  ;;  %v2324_v46 = vpop.f32.mrb[22].mxu1  ;;  %v2387_v25 = vpop.f32.mrb[22].mxu0 }
 0x3de   :  { %v2539_v47 = vadd.f32 %v2383_v42, %v2324_v46  ;;  %v2326_v28 = vpop.f32.mrb[23].mxu1  ;;  %v2389_v48 = vpop.f32.mrb[23].mxu0  ;;  %v2659_v50 = vmul.f32 0.01, %v2627_v43  ;;  %vm2643_vm5 = vcmp.ge.f32.partialorder %v2627_v43, 0.0 }
 0x3df   :  { %v2540_v49 = vadd.f32 %v2385_v45, %v2326_v28  ;;  %v2660_v18 = vmul.f32 0.01, %v2628_v19  ;;  %vm2644_vm6 = vcmp.ge.f32.partialorder %v2628_v19, 0.0 }
 0x3e0   :  { %v2629_v15 = vadd.f32 %v4571_v39, %v2539_v47  ;;  %v2675_v53 = vsel %vm2643_vm5, %v2627_v43, %v2659_v50  ;;  %vm3326_vm5 = vcmask 343040  }
 0x3e1   :  { %v2630_v33 = vadd.f32 %v4574_v40, %v2540_v49  ;;  %v2676_v58 = vsel %vm2644_vm6, %v2628_v19, %v2660_v18 }
 0x3e2   :  { %vm2645_vm7 = vcmp.ge.f32.partialorder %v2629_v15, 0.0  ;;  %v2661_v51 = vmul.f32 0.01, %v2629_v15 }
 0x3e3   :  { %vm2646_vm8 = vcmp.ge.f32.partialorder %v2630_v33, 0.0  ;;  %v2662_v52 = vmul.f32 0.01, %v2630_v33 }
 0x3e4   :  { %v2677_v54 = vsel %vm2645_vm7, %v2629_v15, %v2661_v51 }
 0x3e5   :  { %v2691_v55 = vpack.c.bf16 %v2677_v54, %v2675_v53  ;;  %v2678_v59 = vsel %vm2646_vm8, %v2630_v33, %v2662_v52 }
 0x3e6   :  { %v2692_v60 = vpack.c.bf16 %v2678_v59, %v2676_v58 }
 0x3e8   :  { %3051 = vmatprep.mubr.bf16.mxu0 %v2692_v60  ;;  %3124 = vmatprep.mubr.bf16.mxu1 %v2692_v60 }
 0x3e9   :  { %3052 = vmatmul.mubr.bf16.vlgmr.msra.gmra.mrb[32].mxu0 %v2691_v55  ;;  %3125 = vmatmul.mubr.bf16.vlgmr.msra.gmra.mrb[44].mxu1 %v2691_v55 }
 0x41b   :  { %v2330_v61 = vpop.f32.mrb[24].mxu1  ;;  %v2393_v62 = vpop.f32.mrb[24].mxu0 }
 0x41c   :  { %v2541_v63 = vadd.f32 %v2387_v25, %v2330_v61  ;;  %v2332_v0 = vpop.f32.mrb[25].mxu1  ;;  %v2395_v1 = vpop.f32.mrb[25].mxu0 }
 0x41d   :  { %v2542_v27 = vadd.f32 %v2389_v48, %v2332_v0  ;;  %v2334_v2 = vpop.f32.mrb[26].mxu1  ;;  %v2397_v30 = vpop.f32.mrb[26].mxu0 }
 0x41e   :  { %v2543_v4 = vadd.f32 %v2393_v62, %v2334_v2  ;;  %v2336_v5 = vpop.f32.mrb[27].mxu1  ;;  %v2399_v56 = vpop.f32.mrb[27].mxu0 }
 0x41f   :  { %v2544_v6 = vadd.f32 %v2395_v1, %v2336_v5 }
 0x423   :  { %v2340_v7 = vpop.f32.mrb[28].mxu1  ;;  %v2403_v8 = vpop.f32.mrb[28].mxu0 }
 0x424   :  { %v2545_v9 = vadd.f32 %v2397_v30, %v2340_v7  ;;  %v2342_v10 = vpop.f32.mrb[29].mxu1  ;;  %v2405_v57 = vpop.f32.mrb[29].mxu0 }
 0x425   :  { %v2546_v11 = vadd.f32 %v2399_v56, %v2342_v10  ;;  %v2344_v12 = vpop.f32.mrb[30].mxu1  ;;  %v2407_v13 = vpop.f32.mrb[30].mxu0 }
 0x426   :  { %v2547_v14 = vadd.f32 %v2403_v8, %v2344_v12  ;;  %v2346_v16 = vpop.f32.mrb[31].mxu1  ;;  %v2409_v17 = vpop.f32.mrb[31].mxu0 }
 0x427   :  { %v2548_v22 = vadd.f32 %v2405_v57, %v2346_v16 }
 0x42b   :  { %v2446_v23 = vpop.f32.mrb[32].mxu1 }
 0x42c   :  { %v2575_v31 = vadd.f32 %v2541_v63, %v2446_v23  ;;  %v2448_v26 = vpop.f32.mrb[33].mxu1 }
 0x42d   :  { %v2576_v24 = vadd.f32 %v2542_v27, %v2448_v26  ;;  %v2450_v3 = vpop.f32.mrb[34].mxu1 }
 0x42e   :  { %v2631_v21 = vadd.f32 %v4571_v39, %v2575_v31  ;;  %v2577_v29 = vadd.f32 %v2543_v4, %v2450_v3  ;;  %v2452_v32 = vpop.f32.mrb[35].mxu1 }
 0x42f   :  { %v2632_v20 = vadd.f32 %v4574_v40, %v2576_v24  ;;  %v2578_v34 = vadd.f32 %v2544_v6, %v2452_v32 }
 0x430   :  { %v2663_v35 = vmul.f32 0.01, %v2631_v21  ;;  %v2633_v36 = vadd.f32 %v4571_v39, %v2577_v29  ;;  %vm2647_vm9 = vcmp.ge.f32.partialorder %v2631_v21, 0.0 }
 0x431   :  { %v2664_v37 = vmul.f32 0.01, %v2632_v20  ;;  %v2634_v38 = vadd.f32 %v4574_v40, %v2578_v34  ;;  %vm2648_vm10 = vcmp.ge.f32.partialorder %v2632_v20, 0.0 }
 0x432   :  { %vm2649_vm11 = vcmp.ge.f32.partialorder %v2633_v36, 0.0  ;;  %v2665_v41 = vmul.f32 0.01, %v2633_v36  ;;  %v2679_v19 = vsel %vm2647_vm9, %v2631_v21, %v2663_v35 }
 0x433   :  { %vm2650_vm12 = vcmp.ge.f32.partialorder %v2634_v38, 0.0  ;;  %v2666_v42 = vmul.f32 0.01, %v2634_v38  ;;  %v2456_v43 = vpop.f32.mrb[36].mxu1  ;;  %v2680_v28 = vsel %vm2648_vm10, %v2632_v20, %v2664_v37 }
 0x434   :  { %v2579_v44 = vadd.f32 %v2545_v9, %v2456_v43  ;;  %v2458_v45 = vpop.f32.mrb[37].mxu1  ;;  %v2681_v46 = vsel %vm2649_vm11, %v2633_v36, %v2665_v41 }
 0x435   :  { %v2580_v25 = vadd.f32 %v2546_v11, %v2458_v45  ;;  %v2460_v47 = vpop.f32.mrb[38].mxu1  ;;  %v2682_v48 = vsel %vm2650_vm12, %v2634_v38, %v2666_v42  ;;  %v2693_v49 = vpack.c.bf16 %v2681_v46, %v2679_v19 }
 0x436   :  { %v2635_v50 = vadd.f32 %v4571_v39, %v2579_v44  ;;  %v2581_v15 = vadd.f32 %v2547_v14, %v2460_v47  ;;  %v2462_v18 = vpop.f32.mrb[39].mxu1  ;;  %v2694_v33 = vpack.c.bf16 %v2682_v48, %v2680_v28 }
 0x437   :  { %v2636_v51 = vadd.f32 %v4574_v40, %v2580_v25  ;;  %v2582_v52 = vadd.f32 %v2548_v22, %v2462_v18 }
 0x438   :  { %v2667_v53 = vmul.f32 0.01, %v2635_v50  ;;  %v2637_v54 = vadd.f32 %v4571_v39, %v2581_v15  ;;  %3061 = vmatprep.mubr.bf16.mxu0 %v2694_v33  ;;  %3132 = vmatprep.mubr.bf16.mxu1 %v2694_v33  ;;  %vm2651_vm13 = vcmp.ge.f32.partialorder %v2635_v50, 0.0 }
 0x439   :  { %v2668_v55 = vmul.f32 0.01, %v2636_v51  ;;  %v2638_v58 = vadd.f32 %v4574_v40, %v2582_v52  ;;  %3062 = vmatmul.mubr.bf16.gmra.mrb[36].mxu0 %v2693_v49  ;;  %3133 = vmatmul.mubr.bf16.gmra.mrb[48].mxu1 %v2693_v49  ;;  %vm2652_vm14 = vcmp.ge.f32.partialorder %v2636_v51, 0.0 }
 0x43a   :  { %vm2653_vm15 = vcmp.ge.f32.partialorder %v2637_v54, 0.0  ;;  %v2669_v59 = vmul.f32 0.01, %v2637_v54  ;;  %v2683_v0 = vsel %vm2651_vm13, %v2635_v50, %v2667_v53 }
 0x43b   :  { %vm2654_vm0 = vcmp.ge.f32.partialorder %v2638_v58, 0.0  ;;  %v2670_v60 = vmul.f32 0.01, %v2638_v58  ;;  %v2466_v61 = vpop.f32.mrb[40].mxu1  ;;  %v2684_v30 = vsel %vm2652_vm14, %v2636_v51, %v2668_v55 }
 0x43c   :  { %v2583_v62 = vadd.f32 %v2466_v61, %v2407_v13  ;;  %v2468_v63 = vpop.f32.mrb[41].mxu1  ;;  %v2685_v1 = vsel %vm2653_vm15, %v2637_v54, %v2669_v59 }
 0x43d   :  { %v2584_v27 = vadd.f32 %v2468_v63, %v2409_v17  ;;  %v2470_v2 = vpop.f32.mrb[42].mxu1  ;;  %v2686_v4 = vsel %vm2654_vm0, %v2638_v58, %v2670_v60  ;;  %v2695_v5 = vpack.c.bf16 %v2685_v1, %v2683_v0 }
 0x43e   :  { %v2639_v56 = vadd.f32 %v4571_v39, %v2583_v62  ;;  %v2641_v6 = vadd.f32 %v4571_v39, %v2470_v2  ;;  %v2472_v7 = vpop.f32.mrb[43].mxu1  ;;  %v2696_v8 = vpack.c.bf16 %v2686_v4, %v2684_v30 }
 0x43f   :  { %v2640_v9 = vadd.f32 %v4574_v40, %v2584_v27  ;;  %v2642_v10 = vadd.f32 %v4574_v40, %v2472_v7  ;;  %v4595_v40 = vld [vmem:[%s4657_s10] ss:$0 sm:$0xff] }
 0x440   :  { %vm2655_vm1 = vcmp.ge.f32.partialorder %v2639_v56, 0.0  ;;  %v2671_v57 = vmul.f32 0.01, %v2639_v56  ;;  %vm2657_vm2 = vcmp.ge.f32.partialorder %v2641_v6, 0.0  ;;  %v2673_v11 = vmul.f32 0.01, %v2641_v6  ;;  %3071 = vmatprep.mubr.bf16.mxu0 %v2696_v8  ;;  %3140 = vmatprep.mubr.bf16.mxu1 %v2696_v8 }
 0x441   :  { %vm2656_vm3 = vcmp.ge.f32.partialorder %v2640_v9, 0.0  ;;  %v2672_v12 = vmul.f32 0.01, %v2640_v9  ;;  %vm2658_vm4 = vcmp.ge.f32.partialorder %v2642_v10, 0.0  ;;  %v2674_v13 = vmul.f32 0.01, %v2642_v10  ;;  %3072 = vmatmul.mubr.bf16.gmra.mrb[40].mxu0 %v2695_v5  ;;  %3141 = vmatmul.mubr.bf16.gmra.mrb[52].mxu1 %v2695_v5 }
 0x442   :  { %v2687_v14 = vsel %vm2655_vm1, %v2639_v56, %v2671_v57  ;;  %v2689_v39 = vsel %vm2657_vm2, %v2641_v6, %v2673_v11 }
 0x443   :  { %v2688_v16 = vsel %vm2656_vm3, %v2640_v9, %v2672_v12  ;;  %v2690_v17 = vsel %vm2658_vm4, %v2642_v10, %v2674_v13  ;;  %v2697_v22 = vpack.c.bf16 %v2689_v39, %v2687_v14 }
 0x444   :  { %v2698_v23 = vpack.c.bf16 %v2690_v17, %v2688_v16 }
 0x446   :  { %3081 = vmatprep.mubr.bf16.mxu0 %v2698_v23  ;;  %3148 = vmatprep.mubr.bf16.mxu1 %v2698_v23 }
 0x449   :  { %3082 = vmatmul.mubr.bf16.gmra.mrb[44].mxu0 %v2697_v22  ;;  %3149 = vmatmul.mubr.bf16.gmra.mrb[56].mxu1 %v2697_v22 }
 0x4bc   :  { %v3053_v31 = vpop.f32.mrb[32].mxu0  ;;  %v3685_v26 = vpop.f32.mrb[44].mxu1 }
 0x4bd   :  { %v3256_v24 = vadd.f32 %v4595_v40, %v3053_v31  ;;  %v3055_v3 = vpop.f32.mrb[33].mxu0  ;;  %v3686_v21 = vpop.f32.mrb[45].mxu1 }
 0x4be   :  { %v3687_v29 = vadd.f32 %v3686_v21, %v3685_v26  ;;  %v3057_v32 = vpop.f32.mrb[34].mxu0  ;;  %v3688_v20 = vpop.f32.mrb[46].mxu1 }
 0x4bf   :  { %v3659_v34 = vmul.f32 -1.442695, %v3256_v24  ;;  %v3199_v35 = vadd.f32 %v3057_v32, %v3055_v3  ;;  %v3059_v36 = vpop.f32.mrb[35].mxu0  ;;  %v3689_v37 = vpop.f32.mrb[47].mxu1 }
 0x4c0   :  { %v3690_v38 = vadd.f32 %v3689_v37, %v3688_v20 }
 0x4c1   :  { %4181 = vpow2.f32 %v3659_v34  ;;  %v3257_v41 = vadd.f32 %v4595_v40, %v3199_v35 }
 0x4c3   :  { %v3660_v42 = vmul.f32 -1.442695, %v3257_v41 }
 0x4c5   :  { %4183 = vpow2.f32 %v3660_v42 }
 0x4cb   :  { %v4182_v43 = vpop.eup %4181 }
 0x4cc   :  { %v3296_v44 = vadd.f32 1.0, %v4182_v43 }
 0x4ce   :  { %4185 = vrcp.f32 %v3296_v44 }
 0x4cf   :  { %v4184_v45 = vpop.eup %4183 }
 0x4d0   :  { %v3297_v19 = vadd.f32 1.0, %v4184_v45 }
 0x4d2   :  { %4187 = vrcp.f32 %v3297_v19 }
 0x4d8   :  { %v4186_v46 = vpop.eup %4185 }
 0x4d9   :  { %3327 = vst.msk [vmem:[%s4658_s11] sm:$0xff] %vm3326_vm5, %v4186_v46 }
 0x4dc   :  { %v4188_v25 = vpop.eup %4187 }
 0x4dd   :  { %3328 = vst.msk [vmem:[%s4658_s11 + $0x8] sm:$0xff] %vm3326_vm5, %v4188_v25 }
 0x50c   :  { %v3063_v47 = vpop.f32.mrb[36].mxu0  ;;  %v3691_v28 = vpop.f32.mrb[48].mxu1 }
 0x50d   :  { %v3200_v48 = vadd.f32 %v3063_v47, %v3059_v36  ;;  %v3065_v49 = vpop.f32.mrb[37].mxu0  ;;  %v3692_v50 = vpop.f32.mrb[49].mxu1 }
 0x50e   :  { %v3693_v15 = vadd.f32 %v3692_v50, %v3691_v28  ;;  %v3067_v18 = vpop.f32.mrb[38].mxu0  ;;  %v3694_v33 = vpop.f32.mrb[50].mxu1 }
 0x50f   :  { %v3223_v51 = vadd.f32 %v3687_v29, %v3200_v48  ;;  %v3201_v52 = vadd.f32 %v3067_v18, %v3065_v49  ;;  %v3069_v53 = vpop.f32.mrb[39].mxu0  ;;  %v3695_v54 = vpop.f32.mrb[51].mxu1 }
 0x510   :  { %v3696_v55 = vadd.f32 %v3695_v54, %v3694_v33 }
 0x511   :  { %v3258_v58 = vadd.f32 %v4595_v40, %v3223_v51  ;;  %v3224_v59 = vadd.f32 %v3690_v38, %v3201_v52 }
 0x513   :  { %v3661_v60 = vmul.f32 -1.442695, %v3258_v58  ;;  %v3259_v61 = vadd.f32 %v4595_v40, %v3224_v59 }
 0x514   :  { %v3073_v62 = vpop.f32.mrb[40].mxu0  ;;  %v3697_v63 = vpop.f32.mrb[52].mxu1 }
 0x515   :  { %4189 = vpow2.f32 %v3661_v60  ;;  %v3662_v0 = vmul.f32 -1.442695, %v3259_v61  ;;  %v3202_v1 = vadd.f32 %v3073_v62, %v3069_v53  ;;  %v3075_v27 = vpop.f32.mrb[41].mxu0  ;;  %v3698_v2 = vpop.f32.mrb[53].mxu1 }
 0x516   :  { %v3699_v30 = vadd.f32 %v3698_v2, %v3697_v63  ;;  %v3077_v4 = vpop.f32.mrb[42].mxu0  ;;  %v3700_v5 = vpop.f32.mrb[54].mxu1 }
 0x517   :  { %4191 = vpow2.f32 %v3662_v0  ;;  %v3225_v56 = vadd.f32 %v3693_v15, %v3202_v1  ;;  %v3203_v6 = vadd.f32 %v3077_v4, %v3075_v27  ;;  %v3079_v7 = vpop.f32.mrb[43].mxu0  ;;  %v3701_v8 = vpop.f32.mrb[55].mxu1 }
 0x518   :  { %v3702_v9 = vadd.f32 %v3701_v8, %v3700_v5 }
 0x519   :  { %v3260_v10 = vadd.f32 %v4595_v40, %v3225_v56  ;;  %v3226_v57 = vadd.f32 %v3696_v55, %v3203_v6 }
 0x51b   :  { %v3663_v11 = vmul.f32 -1.442695, %v3260_v10  ;;  %v3261_v12 = vadd.f32 %v4595_v40, %v3226_v57 }
 0x51c   :  { %v3083_v13 = vpop.f32.mrb[44].mxu0  ;;  %v3703_v14 = vpop.f32.mrb[56].mxu1 }
 0x51d   :  { %4193 = vpow2.f32 %v3663_v11  ;;  %v3664_v39 = vmul.f32 -1.442695, %v3261_v12  ;;  %v3204_v16 = vadd.f32 %v3083_v13, %v3079_v7  ;;  %v3085_v17 = vpop.f32.mrb[45].mxu0  ;;  %v3704_v22 = vpop.f32.mrb[57].mxu1 }
 0x51e   :  { %v3705_v23 = vadd.f32 %v3704_v22, %v3703_v14  ;;  %v3087_v31 = vpop.f32.mrb[46].mxu0  ;;  %v3706_v26 = vpop.f32.mrb[58].mxu1 }
 0x51f   :  { %v4190_v24 = vpop.eup %4189  ;;  %4195 = vpow2.f32 %v3664_v39  ;;  %v3227_v3 = vadd.f32 %v3699_v30, %v3204_v16  ;;  %v3205_v21 = vadd.f32 %v3087_v31, %v3085_v17  ;;  %v3089_v29 = vpop.f32.mrb[47].mxu0 }
 0x520   :  { %v3707_v32 = vpop.f32.mrb[59].mxu1  ;;  %v3298_v20 = vadd.f32 1.0, %v4190_v24  ;;  %v3229_v34 = vadd.f32 %v3705_v23, %v3089_v29 }
 0x521   :  { %v3708_v35 = vadd.f32 %v3707_v32, %v3706_v26  ;;  %v4192_v36 = vpop.eup %4191  ;;  %v3262_v37 = vadd.f32 %v4595_v40, %v3227_v3  ;;  %v3228_v38 = vadd.f32 %v3702_v9, %v3205_v21 }
 0x522   :  { %4197 = vrcp.f32 %v3298_v20  ;;  %v3299_v41 = vadd.f32 1.0, %v4192_v36  ;;  %v3264_v42 = vadd.f32 %v4595_v40, %v3229_v34 }
 0x523   :  { %v3265_v43 = vadd.f32 %v3708_v35, %v4595_v40  ;;  %v3665_v44 = vmul.f32 -1.442695, %v3262_v37  ;;  %v3263_v45 = vadd.f32 %v4595_v40, %v3228_v38 }
 0x524   :  { %4199 = vrcp.f32 %v3299_v41  ;;  %v3667_v19 = vmul.f32 -1.442695, %v3264_v42 }
 0x525   :  { %v3668_v46 = vmul.f32 -1.442695, %v3265_v43  ;;  %4201 = vpow2.f32 %v3665_v44  ;;  %v3666_v25 = vmul.f32 -1.442695, %v3263_v45 }
 0x526   :  { %4203 = vpow2.f32 %v3667_v19 }
 0x527   :  { %v4194_v47 = vpop.eup %4193  ;;  %4205 = vpow2.f32 %v3666_v25 }
 0x528   :  { %v3300_v28 = vadd.f32 1.0, %v4194_v47  ;;  %4207 = vpow2.f32 %v3668_v46 }
 0x529   :  { %v4196_v48 = vpop.eup %4195 }
 0x52a   :  { %4209 = vrcp.f32 %v3300_v28  ;;  %v3301_v49 = vadd.f32 1.0, %v4196_v48 }
 0x52c   :  { %v4198_v50 = vpop.eup %4197  ;;  %4211 = vrcp.f32 %v3301_v49 }
 0x52d   :  { %3329 = vst.msk [vmem:[%s4658_s11 + $0x10] sm:$0xff] %vm3326_vm5, %v4198_v50 }
 0x52e   :  { %v4200_v40 = vpop.eup %4199 }
 0x52f   :  { %v4202_v15 = vpop.eup %4201  ;;  %3330 = vst.msk [vmem:[%s4658_s11 + $0x18] sm:$0xff] %vm3326_vm5, %v4200_v40 }
 0x530   :  { %v4204_v18 = vpop.eup %4203  ;;  %v3302_v33 = vadd.f32 1.0, %v4202_v15 }
 0x531   :  { %v4206_v51 = vpop.eup %4205  ;;  %v3304_v52 = vadd.f32 1.0, %v4204_v18 }
 0x532   :  { %v4208_v53 = vpop.eup %4207  ;;  %4213 = vrcp.f32 %v3302_v33  ;;  %v3303_v54 = vadd.f32 1.0, %v4206_v51 }
 0x533   :  { %4215 = vrcp.f32 %v3304_v52  ;;  %v3305_v55 = vadd.f32 1.0, %v4208_v53 }
 0x534   :  { %v4210_v58 = vpop.eup %4209  ;;  %4217 = vrcp.f32 %v3303_v54 }
 0x535   :  { %3331 = vst.msk [vmem:[%s4658_s11 + $0x20] sm:$0xff] %vm3326_vm5, %v4210_v58  ;;  %4219 = vrcp.f32 %v3305_v55 }
 0x536   :  { %v4212_v59 = vpop.eup %4211 }
 0x537   :  { %3332 = vst.msk [vmem:[%s4658_s11 + $0x28] sm:$0xff] %vm3326_vm5, %v4212_v59 }
 0x53c   :  { %v4214_v60 = vpop.eup %4213 }
 0x53d   :  { %v4216_v61 = vpop.eup %4215  ;;  %3333 = vst.msk [vmem:[%s4658_s11 + $0x30] sm:$0xff] %vm3326_vm5, %v4214_v60 }
 0x53e   :  { %v4218_v62 = vpop.eup %4217  ;;  %3335 = vst.msk [vmem:[%s4658_s11 + $0x40] sm:$0xff] %vm3326_vm5, %v4216_v61 }
 0x53f   :  { %v4220_v63 = vpop.eup %4219  ;;  %3334 = vst.msk [vmem:[%s4658_s11 + $0x38] sm:$0xff] %vm3326_vm5, %v4218_v62 }
 0x540   :  { %3336 = vst.msk [vmem:[%s4658_s11 + $0x48] sm:$0xff] %vm3326_vm5, %v4220_v63 }
 0x541   :  { %3341 = vsyncpa [#allocation8], 1 }
 0x542   :  { %3342 = vsyncpa [#allocation10], 1 }
 0x543   :  { %3343 = vsyncpa [#allocation13], 1 }

</bundles_post_ra>
